<compile_context>
chip_gen: v6e
topology: v6e:2x2x1
jax: 0.10.0
libtpu: 0.0.40
codegen_flags: <defaults>
</compile_context>

<pallas_src>
import functools

import jax
import jax.numpy as jnp
from jax import lax
from jax.experimental import pallas as pl
from jax.experimental.pallas import tpu as pltpu

NEG_LARGE = -1e30


def _round_up(x, m):
    return (x + m - 1) // m * m


def _ctc_kernel(x_ref, seqs_ref, seqlens_ref, loss_ref,
                fwd_ref, masks_ref, final_ref,
                *, sharp, inv_norm, tt):
    tb = pl.program_id(1)                       # time-block index (sequential)

    @pl.when(tb == 0)
    def _init():
        # Forward lattice: fwd[0] = 0, rest = -1e30 (keep the lattice in f32).
        row = lax.broadcasted_iota(jnp.int32, fwd_ref.shape, 0)
        fwd_ref[...] = jnp.where(row == 0, 0.0, NEG_LARGE).astype(jnp.float32)
        # Hoisted, time-invariant one-hot masks realizing torch.gather(xt, 1, seqs).
        seqs = seqs_ref[...]                    # (ns_pad, NB) int32
        for c in range(4):
            masks_ref[c] = (seqs == c).astype(jnp.float32)
        # Hoisted finalize mask: selects fwd[seqlens[b], b].
        final_ref[...] = (row == seqlens_ref[...]).astype(jnp.float32)

    # Loop-invariant loads, hoisted out of the recurrence.
    m0 = masks_ref[0]
    m1 = masks_ref[1]
    m2 = masks_ref[2]
    m3 = masks_ref[3]
    nb_lanes = fwd_ref.shape[1]
    neg_row = jnp.full((1, nb_lanes), NEG_LARGE, jnp.float32)

    def step(t, fwd):
        xt = x_ref[t].astype(jnp.float32)       # (5, NB)
        if sharp != 1.0:
            xt = xt * sharp
        # "stay": xt[4] broadcast (sublane stride-0) over the whole lattice.
        stay = xt[4:5, :] + fwd
        # "move": gathered label score + prev shifted down by one lattice row.
        gathered = (m0 * xt[0:1, :] + m1 * xt[1:2, :]
                    + m2 * xt[2:3, :] + m3 * xt[3:4, :])
        prev_shift = jnp.concatenate([neg_row, fwd[:-1, :]], axis=0)
        move = gathered + prev_shift
        return jnp.logaddexp(move, stay)

    unroll = True if tt <= 32 else 8
    fwd_ref[...] = lax.fori_loop(0, tt, step, fwd_ref[...], unroll=unroll)

    @pl.when(tb == pl.num_programs(1) - 1)
    def _finalize():
        sel = final_ref[...] * fwd_ref[...]                 # gather(fwd, seqlens)
        loss = -jnp.sum(sel, axis=0, keepdims=True) * inv_norm
        loss_ref[...] = loss.astype(loss_ref.dtype)         # lane-dense (1, NB) store


def ctc_loss_pallas(x, seqs, seqlens, sharp=1.0, time_block=128):
    nt, nb, nf = x.shape
    assert nf == 5, "CTC requires 5 features"
    nbs, ns = seqs.shape
    assert nbs == nb and seqlens.shape[0] == nb
    # NOTE: labels are assumed to be in [0, 4); out-of-range labels contribute 0.

    # ---- layout flip: batch on lanes -------------------------------------
    x_t = jnp.transpose(x, (0, 2, 1))                       # (nt, 5, nb)

    # ---- time blocking (+ no-op padding so TT | nt_pad) --------------------
    tt = max(1, min(int(time_block), nt))
    nt_pad = _round_up(nt, tt)
    if nt_pad != nt:
        pad = jnp.concatenate(
            [jnp.full((nt_pad - nt, 4, nb), NEG_LARGE, x_t.dtype),
             jnp.zeros((nt_pad - nt, 1, nb), x_t.dtype)], axis=1)
        x_t = jnp.concatenate([x_t, pad], axis=0)

    # ---- lattice: (ns+1) rows on sublanes, padded to a multiple of 8 -------
    ns_pad = _round_up(ns + 1, 8)
    seqs_t = jnp.zeros((ns_pad, nb), jnp.int32).at[1:ns + 1, :].set(
        seqs.astype(jnp.int32).T)                           # row s holds seqs[:, s-1]
    seqlens2d = seqlens.astype(jnp.int32)[None, :]          # (1, nb)

    # ---- batch blocking: "parallel" axis (v7x dual-core); keep >=128 lanes --
    if nb >= 512 and nb % 256 == 0:
        nbk = 256          # bounds vreg pressure when ns_pad is large
    else:
        nbk = nb

    kernel = functools.partial(
        _ctc_kernel, sharp=float(sharp),
        inv_norm=1.0 / (nt * float(sharp)), tt=tt)

    out = pl.pallas_call(
        kernel,
        out_shape=jax.ShapeDtypeStruct((1, nb), x.dtype),
        grid_spec=pltpu.PrefetchScalarGridSpec(
            num_scalar_prefetch=0,
            grid=(nb // nbk, nt_pad // tt),                 # time axis last (sequential)
            in_specs=[
                pl.BlockSpec((tt, 5, nbk), lambda b, t: (t, 0, b)),   # x time slab
                pl.BlockSpec((ns_pad, nbk), lambda b, t: (0, b)),     # labels
                pl.BlockSpec((1, nbk), lambda b, t: (0, b)),          # seqlens
            ],
            out_specs=pl.BlockSpec((1, nbk), lambda b, t: (0, b)),
            scratch_shapes=[
                pltpu.VMEM((ns_pad, nbk), jnp.float32),      # forward lattice (f32)
                pltpu.VMEM((4, ns_pad, nbk), jnp.float32),   # hoisted one-hot masks
                pltpu.VMEM((ns_pad, nbk), jnp.float32),      # hoisted finalize mask
            ],
        ),
        compiler_params=pltpu.CompilerParams(
            dimension_semantics=("parallel", "arbitrary"),
            vmem_limit_bytes=48 * 1024 * 1024),
    )(x_t, seqs_t, seqlens2d)

    return out.reshape(nb, 1)                               # match module's (nb, 1)


def ctc_loss_ref(x, seqs, seqlens, sharp=1.0):
    """Pure-JAX reference mirroring the PyTorch module."""
    nt, nb, nf = x.shape
    ns = seqs.shape[1]
    fwd = jnp.full((nb, ns + 1), NEG_LARGE, jnp.float32).at[:, 0].set(0.0)
    for t in range(nt):
        xt = x[t].astype(jnp.float32) * sharp
        stay = xt[:, 4:5] + fwd
        move = jnp.take_along_axis(xt, seqs, axis=1) + fwd[:, :-1]
        fwd = stay.at[:, 1:].set(jnp.logaddexp(move, stay[:, 1:]))
    return -jnp.take_along_axis(fwd, seqlens[:, None], axis=1) / (nt * sharp)


if __name__ == "__main__":
    key = jax.random.PRNGKey(0)
    k1, k2, k3 = jax.random.split(key, 3)

    nt, nb, nf, ns = 20, 4, 5, 8          # nt=20 with time_block=8 exercises padding
    sharp = 1.0

    x = jax.random.normal(k1, (nt, nb, nf), dtype=jnp.float32)
    seqs = jax.random.randint(k2, (nb, ns), 0, 4, dtype=jnp.int32)
    seqlens = jax.random.randint(k3, (nb,), 1, ns + 1, dtype=jnp.int32)

    out = ctc_loss_pallas(x, seqs, seqlens, sharp=sharp, time_block=8)
    out = jax.block_until_ready(out)

    ref = ctc_loss_ref(x, seqs, seqlens, sharp=sharp)
    assert out.shape == (nb, 1)
    assert jnp.allclose(out, ref, rtol=1e-5, atol=1e-5), (out, ref)

    print("KERNEL_OK")
</pallas_src>

<mosaic_0001>
module attributes {stable_mosaic.version = 11 : i64} {
  func.func @_ctc_kernel(%arg0: i32, %arg1: i32, %arg2: memref<8x5x4xf32, #tpu.memory_space<vmem>>, %arg3: memref<16x4xi32, #tpu.memory_space<vmem>>, %arg4: memref<1x4xi32, #tpu.memory_space<vmem>>, %arg5: memref<1x4xf32, #tpu.memory_space<vmem>>, %arg6: memref<16x4xf32, #tpu.memory_space<vmem>>, %arg7: memref<4x16x4xf32, #tpu.memory_space<vmem>>, %arg8: memref<16x4xf32, #tpu.memory_space<vmem>>) attributes {dimension_semantics = [#tpu.dimension_semantics<parallel>, #tpu.dimension_semantics<arbitrary>], iteration_bounds = array<i64: 1, 3>, scalar_prefetch = 0 : i64, scratch_operands = 3 : i64, tpu.core_type = #tpu.core_type<tc>, window_params = [{transform_indices = @transform_0, window_bounds = array<i64: 8, 5, 4>}, {transform_indices = @transform_1, window_bounds = array<i64: 16, 4>}, {transform_indices = @transform_2, window_bounds = array<i64: 1, 4>}, {transform_indices = @transform_3, window_bounds = array<i64: 1, 4>}]} {
    %c0_i32 = arith.constant 0 : i32
    %0 = arith.cmpi eq, %arg1, %c0_i32 : i32
    %1 = arith.extui %0 : i1 to i32
    %c0_i32_0 = arith.constant 0 : i32
    %2 = arith.cmpi ne, %1, %c0_i32_0 : i32
    scf.if %2 {
      %297 = tpu.iota {dimensions = array<i32: 0>} : vector<16x4xi32>
      %c0_i32_40 = arith.constant 0 : i32
      %298 = vector.broadcast %c0_i32_40 : i32 to vector<16x4xi32>
      %299 = arith.cmpi eq, %297, %298 : vector<16x4xi32>
      %cst_41 = arith.constant 0.000000e+00 : f32
      %cst_42 = arith.constant -1.000000e+30 : f32
      %300 = vector.broadcast %cst_41 : f32 to vector<16x4xf32>
      %301 = vector.broadcast %cst_42 : f32 to vector<16x4xf32>
      %302 = arith.select %299, %300, %301 : vector<16x4xi1>, vector<16x4xf32>
      %c0_43 = arith.constant 0 : index
      %c0_44 = arith.constant 0 : index
      %303 = vector.load %arg6[%c0_43, %c0_44] : memref<16x4xf32, #tpu.memory_space<vmem>>, vector<16x4xf32>
      tpu.vector_store %arg6[%c0_43, %c0_44], %302 {strides = array<i32>} : memref<16x4xf32, #tpu.memory_space<vmem>>, vector<16x4xf32>,
      %c0_45 = arith.constant 0 : index
      %c0_46 = arith.constant 0 : index
      %304 = vector.load %arg3[%c0_45, %c0_46] : memref<16x4xi32, #tpu.memory_space<vmem>>, vector<16x4xi32>
      %c0_i32_47 = arith.constant 0 : i32
      %305 = vector.broadcast %c0_i32_47 : i32 to vector<16x4xi32>
      %306 = arith.cmpi eq, %304, %305 : vector<16x4xi32>
      %307 = arith.extui %306 : vector<16x4xi1> to vector<16x4xi32>
      %308 = arith.sitofp %307 : vector<16x4xi32> to vector<16x4xf32>
      %c0_48 = arith.constant 0 : index
      %c0_49 = arith.constant 0 : index
      %c0_50 = arith.constant 0 : index
      %309 = vector.load %arg7[%c0_48, %c0_49, %c0_50] : memref<4x16x4xf32, #tpu.memory_space<vmem>>, vector<1x16x4xf32>
      %310 = vector.shape_cast %309 : vector<1x16x4xf32> to vector<16x4xf32>
      %311 = vector.shape_cast %308 : vector<16x4xf32> to vector<1x16x4xf32>
      tpu.vector_store %arg7[%c0_48, %c0_49, %c0_50], %311 {strides = array<i32>} : memref<4x16x4xf32, #tpu.memory_space<vmem>>, vector<1x16x4xf32>,
      %c1_i32_51 = arith.constant 1 : i32
      %312 = vector.broadcast %c1_i32_51 : i32 to vector<16x4xi32>
      %313 = arith.cmpi eq, %304, %312 : vector<16x4xi32>
      %314 = arith.extui %313 : vector<16x4xi1> to vector<16x4xi32>
      %315 = arith.sitofp %314 : vector<16x4xi32> to vector<16x4xf32>
      %c1_52 = arith.constant 1 : index
      %c0_53 = arith.constant 0 : index
      %c0_54 = arith.constant 0 : index
      %316 = vector.load %arg7[%c1_52, %c0_53, %c0_54] : memref<4x16x4xf32, #tpu.memory_space<vmem>>, vector<1x16x4xf32>
      %317 = vector.shape_cast %316 : vector<1x16x4xf32> to vector<16x4xf32>
      %318 = vector.shape_cast %315 : vector<16x4xf32> to vector<1x16x4xf32>
      tpu.vector_store %arg7[%c1_52, %c0_53, %c0_54], %318 {strides = array<i32>} : memref<4x16x4xf32, #tpu.memory_space<vmem>>, vector<1x16x4xf32>,
      %c2_i32_55 = arith.constant 2 : i32
      %319 = vector.broadcast %c2_i32_55 : i32 to vector<16x4xi32>
      %320 = arith.cmpi eq, %304, %319 : vector<16x4xi32>
      %321 = arith.extui %320 : vector<16x4xi1> to vector<16x4xi32>
      %322 = arith.sitofp %321 : vector<16x4xi32> to vector<16x4xf32>
      %c2_56 = arith.constant 2 : index
      %c0_57 = arith.constant 0 : index
      %c0_58 = arith.constant 0 : index
      %323 = vector.load %arg7[%c2_56, %c0_57, %c0_58] : memref<4x16x4xf32, #tpu.memory_space<vmem>>, vector<1x16x4xf32>
      %324 = vector.shape_cast %323 : vector<1x16x4xf32> to vector<16x4xf32>
      %325 = vector.shape_cast %322 : vector<16x4xf32> to vector<1x16x4xf32>
      tpu.vector_store %arg7[%c2_56, %c0_57, %c0_58], %325 {strides = array<i32>} : memref<4x16x4xf32, #tpu.memory_space<vmem>>, vector<1x16x4xf32>,
      %c3_i32_59 = arith.constant 3 : i32
      %326 = vector.broadcast %c3_i32_59 : i32 to vector<16x4xi32>
      %327 = arith.cmpi eq, %304, %326 : vector<16x4xi32>
      %328 = arith.extui %327 : vector<16x4xi1> to vector<16x4xi32>
      %329 = arith.sitofp %328 : vector<16x4xi32> to vector<16x4xf32>
      %c3_60 = arith.constant 3 : index
      %c0_61 = arith.constant 0 : index
      %c0_62 = arith.constant 0 : index
      %330 = vector.load %arg7[%c3_60, %c0_61, %c0_62] : memref<4x16x4xf32, #tpu.memory_space<vmem>>, vector<1x16x4xf32>
      %331 = vector.shape_cast %330 : vector<1x16x4xf32> to vector<16x4xf32>
      %332 = vector.shape_cast %329 : vector<16x4xf32> to vector<1x16x4xf32>
      tpu.vector_store %arg7[%c3_60, %c0_61, %c0_62], %332 {strides = array<i32>} : memref<4x16x4xf32, #tpu.memory_space<vmem>>, vector<1x16x4xf32>,
      %c0_63 = arith.constant 0 : index
      %c0_64 = arith.constant 0 : index
      %333 = vector.load %arg4[%c0_63, %c0_64] : memref<1x4xi32, #tpu.memory_space<vmem>>, vector<1x4xi32>
      %334 = vector.broadcast %333 : vector<1x4xi32> to vector<16x4xi32>
      %335 = arith.cmpi eq, %297, %334 : vector<16x4xi32>
      %336 = arith.extui %335 : vector<16x4xi1> to vector<16x4xi32>
      %337 = arith.sitofp %336 : vector<16x4xi32> to vector<16x4xf32>
      %c0_65 = arith.constant 0 : index
      %c0_66 = arith.constant 0 : index
      %338 = vector.load %arg8[%c0_65, %c0_66] : memref<16x4xf32, #tpu.memory_space<vmem>>, vector<16x4xf32>
      tpu.vector_store %arg8[%c0_65, %c0_66], %337 {strides = array<i32>} : memref<16x4xf32, #tpu.memory_space<vmem>>, vector<16x4xf32>,
    } else {
    }
    %c0 = arith.constant 0 : index
    %c0_1 = arith.constant 0 : index
    %c0_2 = arith.constant 0 : index
    %3 = vector.load %arg7[%c0, %c0_1, %c0_2] : memref<4x16x4xf32, #tpu.memory_space<vmem>>, vector<1x16x4xf32>
    %4 = vector.shape_cast %3 : vector<1x16x4xf32> to vector<16x4xf32>
    %c1 = arith.constant 1 : index
    %c0_3 = arith.constant 0 : index
    %c0_4 = arith.constant 0 : index
    %5 = vector.load %arg7[%c1, %c0_3, %c0_4] : memref<4x16x4xf32, #tpu.memory_space<vmem>>, vector<1x16x4xf32>
    %6 = vector.shape_cast %5 : vector<1x16x4xf32> to vector<16x4xf32>
    %c2 = arith.constant 2 : index
    %c0_5 = arith.constant 0 : index
    %c0_6 = arith.constant 0 : index
    %7 = vector.load %arg7[%c2, %c0_5, %c0_6] : memref<4x16x4xf32, #tpu.memory_space<vmem>>, vector<1x16x4xf32>
    %8 = vector.shape_cast %7 : vector<1x16x4xf32> to vector<16x4xf32>
    %c3 = arith.constant 3 : index
    %c0_7 = arith.constant 0 : index
    %c0_8 = arith.constant 0 : index
    %9 = vector.load %arg7[%c3, %c0_7, %c0_8] : memref<4x16x4xf32, #tpu.memory_space<vmem>>, vector<1x16x4xf32>
    %10 = vector.shape_cast %9 : vector<1x16x4xf32> to vector<16x4xf32>
    %cst = arith.constant -1.000000e+30 : f32
    %11 = vector.broadcast %cst : f32 to vector<1x4xf32>
    %c0_9 = arith.constant 0 : index
    %c0_10 = arith.constant 0 : index
    %12 = vector.load %arg6[%c0_9, %c0_10] : memref<16x4xf32, #tpu.memory_space<vmem>>, vector<16x4xf32>
    %c0_i32_11 = arith.constant 0 : i32
    %13 = arith.index_cast %c0_i32_11 : i32 to index
    %c0_12 = arith.constant 0 : index
    %c0_13 = arith.constant 0 : index
    %14 = vector.load %arg2[%13, %c0_12, %c0_13] : memref<8x5x4xf32, #tpu.memory_space<vmem>>, vector<1x5x4xf32>
    %15 = vector.shape_cast %14 : vector<1x5x4xf32> to vector<5x4xf32>
    %16 = vector.extract_strided_slice %15 {offsets = [4, 0], sizes = [1, 4], strides = [1, 1]} : vector<5x4xf32> to vector<1x4xf32>
    %17 = vector.broadcast %16 : vector<1x4xf32> to vector<16x4xf32>
    %18 = arith.addf %17, %12 : vector<16x4xf32>
    %19 = vector.extract_strided_slice %15 {offsets = [0, 0], sizes = [1, 4], strides = [1, 1]} : vector<5x4xf32> to vector<1x4xf32>
    %20 = vector.broadcast %19 : vector<1x4xf32> to vector<16x4xf32>
    %21 = arith.mulf %4, %20 : vector<16x4xf32>
    %22 = vector.extract_strided_slice %15 {offsets = [1, 0], sizes = [1, 4], strides = [1, 1]} : vector<5x4xf32> to vector<1x4xf32>
    %23 = vector.broadcast %22 : vector<1x4xf32> to vector<16x4xf32>
    %24 = arith.mulf %6, %23 : vector<16x4xf32>
    %25 = arith.addf %21, %24 : vector<16x4xf32>
    %26 = vector.extract_strided_slice %15 {offsets = [2, 0], sizes = [1, 4], strides = [1, 1]} : vector<5x4xf32> to vector<1x4xf32>
    %27 = vector.broadcast %26 : vector<1x4xf32> to vector<16x4xf32>
    %28 = arith.mulf %8, %27 : vector<16x4xf32>
    %29 = arith.addf %25, %28 : vector<16x4xf32>
    %30 = vector.extract_strided_slice %15 {offsets = [3, 0], sizes = [1, 4], strides = [1, 1]} : vector<5x4xf32> to vector<1x4xf32>
    %31 = vector.broadcast %30 : vector<1x4xf32> to vector<16x4xf32>
    %32 = arith.mulf %10, %31 : vector<16x4xf32>
    %33 = arith.addf %29, %32 : vector<16x4xf32>
    %34 = vector.extract_strided_slice %12 {offsets = [0, 0], sizes = [15, 4], strides = [1, 1]} : vector<16x4xf32> to vector<15x4xf32>
    %35 = tpu.concatenate %11, %34 in 0 : vector<1x4xf32>, vector<15x4xf32> -> vector<16x4xf32>
    %36 = arith.addf %33, %35 : vector<16x4xf32>
    %37 = arith.maximumf %36, %18 : vector<16x4xf32>
    %38 = arith.subf %36, %18 : vector<16x4xf32>
    %39 = arith.cmpf one, %38, %38 : vector<16x4xf32>
    %40 = arith.addf %36, %18 : vector<16x4xf32>
    %41 = math.absf %38 : vector<16x4xf32>
    %cst_14 = arith.constant 0.000000e+00 : f32
    %42 = vector.broadcast %cst_14 : f32 to vector<16x4xf32>
    %43 = arith.subf %42, %41 : vector<16x4xf32>
    %44 = math.exp %43 : vector<16x4xf32>
    %45 = math.log1p %44 : vector<16x4xf32>
    %46 = arith.addf %37, %45 : vector<16x4xf32>
    %47 = arith.select %39, %40, %46 : vector<16x4xi1>, vector<16x4xf32>
    %c1_i32 = arith.constant 1 : i32
    %48 = arith.index_cast %c1_i32 : i32 to index
    %c0_15 = arith.constant 0 : index
    %c0_16 = arith.constant 0 : index
    %49 = vector.load %arg2[%48, %c0_15, %c0_16] : memref<8x5x4xf32, #tpu.memory_space<vmem>>, vector<1x5x4xf32>
    %50 = vector.shape_cast %49 : vector<1x5x4xf32> to vector<5x4xf32>
    %51 = vector.extract_strided_slice %50 {offsets = [4, 0], sizes = [1, 4], strides = [1, 1]} : vector<5x4xf32> to vector<1x4xf32>
    %52 = vector.broadcast %51 : vector<1x4xf32> to vector<16x4xf32>
    %53 = arith.addf %52, %47 : vector<16x4xf32>
    %54 = vector.extract_strided_slice %50 {offsets = [0, 0], sizes = [1, 4], strides = [1, 1]} : vector<5x4xf32> to vector<1x4xf32>
    %55 = vector.broadcast %54 : vector<1x4xf32> to vector<16x4xf32>
    %56 = arith.mulf %4, %55 : vector<16x4xf32>
    %57 = vector.extract_strided_slice %50 {offsets = [1, 0], sizes = [1, 4], strides = [1, 1]} : vector<5x4xf32> to vector<1x4xf32>
    %58 = vector.broadcast %57 : vector<1x4xf32> to vector<16x4xf32>
    %59 = arith.mulf %6, %58 : vector<16x4xf32>
    %60 = arith.addf %56, %59 : vector<16x4xf32>
    %61 = vector.extract_strided_slice %50 {offsets = [2, 0], sizes = [1, 4], strides = [1, 1]} : vector<5x4xf32> to vector<1x4xf32>
    %62 = vector.broadcast %61 : vector<1x4xf32> to vector<16x4xf32>
    %63 = arith.mulf %8, %62 : vector<16x4xf32>
    %64 = arith.addf %60, %63 : vector<16x4xf32>
    %65 = vector.extract_strided_slice %50 {offsets = [3, 0], sizes = [1, 4], strides = [1, 1]} : vector<5x4xf32> to vector<1x4xf32>
    %66 = vector.broadcast %65 : vector<1x4xf32> to vector<16x4xf32>
    %67 = arith.mulf %10, %66 : vector<16x4xf32>
    %68 = arith.addf %64, %67 : vector<16x4xf32>
    %69 = vector.extract_strided_slice %47 {offsets = [0, 0], sizes = [15, 4], strides = [1, 1]} : vector<16x4xf32> to vector<15x4xf32>
    %70 = tpu.concatenate %11, %69 in 0 : vector<1x4xf32>, vector<15x4xf32> -> vector<16x4xf32>
    %71 = arith.addf %68, %70 : vector<16x4xf32>
    %72 = arith.maximumf %71, %53 : vector<16x4xf32>
    %73 = arith.subf %71, %53 : vector<16x4xf32>
    %74 = arith.cmpf one, %73, %73 : vector<16x4xf32>
    %75 = arith.addf %71, %53 : vector<16x4xf32>
    %76 = math.absf %73 : vector<16x4xf32>
    %cst_17 = arith.constant 0.000000e+00 : f32
    %77 = vector.broadcast %cst_17 : f32 to vector<16x4xf32>
    %78 = arith.subf %77, %76 : vector<16x4xf32>
    %79 = math.exp %78 : vector<16x4xf32>
    %80 = math.log1p %79 : vector<16x4xf32>
    %81 = arith.addf %72, %80 : vector<16x4xf32>
    %82 = arith.select %74, %75, %81 : vector<16x4xi1>, vector<16x4xf32>
    %c2_i32 = arith.constant 2 : i32
    %83 = arith.index_cast %c2_i32 : i32 to index
    %c0_18 = arith.constant 0 : index
    %c0_19 = arith.constant 0 : index
    %84 = vector.load %arg2[%83, %c0_18, %c0_19] : memref<8x5x4xf32, #tpu.memory_space<vmem>>, vector<1x5x4xf32>
    %85 = vector.shape_cast %84 : vector<1x5x4xf32> to vector<5x4xf32>
    %86 = vector.extract_strided_slice %85 {offsets = [4, 0], sizes = [1, 4], strides = [1, 1]} : vector<5x4xf32> to vector<1x4xf32>
    %87 = vector.broadcast %86 : vector<1x4xf32> to vector<16x4xf32>
    %88 = arith.addf %87, %82 : vector<16x4xf32>
    %89 = vector.extract_strided_slice %85 {offsets = [0, 0], sizes = [1, 4], strides = [1, 1]} : vector<5x4xf32> to vector<1x4xf32>
    %90 = vector.broadcast %89 : vector<1x4xf32> to vector<16x4xf32>
    %91 = arith.mulf %4, %90 : vector<16x4xf32>
    %92 = vector.extract_strided_slice %85 {offsets = [1, 0], sizes = [1, 4], strides = [1, 1]} : vector<5x4xf32> to vector<1x4xf32>
    %93 = vector.broadcast %92 : vector<1x4xf32> to vector<16x4xf32>
    %94 = arith.mulf %6, %93 : vector<16x4xf32>
    %95 = arith.addf %91, %94 : vector<16x4xf32>
    %96 = vector.extract_strided_slice %85 {offsets = [2, 0], sizes = [1, 4], strides = [1, 1]} : vector<5x4xf32> to vector<1x4xf32>
    %97 = vector.broadcast %96 : vector<1x4xf32> to vector<16x4xf32>
    %98 = arith.mulf %8, %97 : vector<16x4xf32>
    %99 = arith.addf %95, %98 : vector<16x4xf32>
    %100 = vector.extract_strided_slice %85 {offsets = [3, 0], sizes = [1, 4], strides = [1, 1]} : vector<5x4xf32> to vector<1x4xf32>
    %101 = vector.broadcast %100 : vector<1x4xf32> to vector<16x4xf32>
    %102 = arith.mulf %10, %101 : vector<16x4xf32>
    %103 = arith.addf %99, %102 : vector<16x4xf32>
    %104 = vector.extract_strided_slice %82 {offsets = [0, 0], sizes = [15, 4], strides = [1, 1]} : vector<16x4xf32> to vector<15x4xf32>
    %105 = tpu.concatenate %11, %104 in 0 : vector<1x4xf32>, vector<15x4xf32> -> vector<16x4xf32>
    %106 = arith.addf %103, %105 : vector<16x4xf32>
    %107 = arith.maximumf %106, %88 : vector<16x4xf32>
    %108 = arith.subf %106, %88 : vector<16x4xf32>
    %109 = arith.cmpf one, %108, %108 : vector<16x4xf32>
    %110 = arith.addf %106, %88 : vector<16x4xf32>
    %111 = math.absf %108 : vector<16x4xf32>
    %cst_20 = arith.constant 0.000000e+00 : f32
    %112 = vector.broadcast %cst_20 : f32 to vector<16x4xf32>
    %113 = arith.subf %112, %111 : vector<16x4xf32>
    %114 = math.exp %113 : vector<16x4xf32>
    %115 = math.log1p %114 : vector<16x4xf32>
    %116 = arith.addf %107, %115 : vector<16x4xf32>
    %117 = arith.select %109, %110, %116 : vector<16x4xi1>, vector<16x4xf32>
    %c3_i32 = arith.constant 3 : i32
    %118 = arith.index_cast %c3_i32 : i32 to index
    %c0_21 = arith.constant 0 : index
    %c0_22 = arith.constant 0 : index
    %119 = vector.load %arg2[%118, %c0_21, %c0_22] : memref<8x5x4xf32, #tpu.memory_space<vmem>>, vector<1x5x4xf32>
    %120 = vector.shape_cast %119 : vector<1x5x4xf32> to vector<5x4xf32>
    %121 = vector.extract_strided_slice %120 {offsets = [4, 0], sizes = [1, 4], strides = [1, 1]} : vector<5x4xf32> to vector<1x4xf32>
    %122 = vector.broadcast %121 : vector<1x4xf32> to vector<16x4xf32>
    %123 = arith.addf %122, %117 : vector<16x4xf32>
    %124 = vector.extract_strided_slice %120 {offsets = [0, 0], sizes = [1, 4], strides = [1, 1]} : vector<5x4xf32> to vector<1x4xf32>
    %125 = vector.broadcast %124 : vector<1x4xf32> to vector<16x4xf32>
    %126 = arith.mulf %4, %125 : vector<16x4xf32>
    %127 = vector.extract_strided_slice %120 {offsets = [1, 0], sizes = [1, 4], strides = [1, 1]} : vector<5x4xf32> to vector<1x4xf32>
    %128 = vector.broadcast %127 : vector<1x4xf32> to vector<16x4xf32>
    %129 = arith.mulf %6, %128 : vector<16x4xf32>
    %130 = arith.addf %126, %129 : vector<16x4xf32>
    %131 = vector.extract_strided_slice %120 {offsets = [2, 0], sizes = [1, 4], strides = [1, 1]} : vector<5x4xf32> to vector<1x4xf32>
    %132 = vector.broadcast %131 : vector<1x4xf32> to vector<16x4xf32>
    %133 = arith.mulf %8, %132 : vector<16x4xf32>
    %134 = arith.addf %130, %133 : vector<16x4xf32>
    %135 = vector.extract_strided_slice %120 {offsets = [3, 0], sizes = [1, 4], strides = [1, 1]} : vector<5x4xf32> to vector<1x4xf32>
    %136 = vector.broadcast %135 : vector<1x4xf32> to vector<16x4xf32>
    %137 = arith.mulf %10, %136 : vector<16x4xf32>
    %138 = arith.addf %134, %137 : vector<16x4xf32>
    %139 = vector.extract_strided_slice %117 {offsets = [0, 0], sizes = [15, 4], strides = [1, 1]} : vector<16x4xf32> to vector<15x4xf32>
    %140 = tpu.concatenate %11, %139 in 0 : vector<1x4xf32>, vector<15x4xf32> -> vector<16x4xf32>
    %141 = arith.addf %138, %140 : vector<16x4xf32>
    %142 = arith.maximumf %141, %123 : vector<16x4xf32>
    %143 = arith.subf %141, %123 : vector<16x4xf32>
    %144 = arith.cmpf one, %143, %143 : vector<16x4xf32>
    %145 = arith.addf %141, %123 : vector<16x4xf32>
    %146 = math.absf %143 : vector<16x4xf32>
    %cst_23 = arith.constant 0.000000e+00 : f32
    %147 = vector.broadcast %cst_23 : f32 to vector<16x4xf32>
    %148 = arith.subf %147, %146 : vector<16x4xf32>
    %149 = math.exp %148 : vector<16x4xf32>
    %150 = math.log1p %149 : vector<16x4xf32>
    %151 = arith.addf %142, %150 : vector<16x4xf32>
    %152 = arith.select %144, %145, %151 : vector<16x4xi1>, vector<16x4xf32>
    %c4_i32 = arith.constant 4 : i32
    %153 = arith.index_cast %c4_i32 : i32 to index
    %c0_24 = arith.constant 0 : index
    %c0_25 = arith.constant 0 : index
    %154 = vector.load %arg2[%153, %c0_24, %c0_25] : memref<8x5x4xf32, #tpu.memory_space<vmem>>, vector<1x5x4xf32>
    %155 = vector.shape_cast %154 : vector<1x5x4xf32> to vector<5x4xf32>
    %156 = vector.extract_strided_slice %155 {offsets = [4, 0], sizes = [1, 4], strides = [1, 1]} : vector<5x4xf32> to vector<1x4xf32>
    %157 = vector.broadcast %156 : vector<1x4xf32> to vector<16x4xf32>
    %158 = arith.addf %157, %152 : vector<16x4xf32>
    %159 = vector.extract_strided_slice %155 {offsets = [0, 0], sizes = [1, 4], strides = [1, 1]} : vector<5x4xf32> to vector<1x4xf32>
    %160 = vector.broadcast %159 : vector<1x4xf32> to vector<16x4xf32>
    %161 = arith.mulf %4, %160 : vector<16x4xf32>
    %162 = vector.extract_strided_slice %155 {offsets = [1, 0], sizes = [1, 4], strides = [1, 1]} : vector<5x4xf32> to vector<1x4xf32>
    %163 = vector.broadcast %162 : vector<1x4xf32> to vector<16x4xf32>
    %164 = arith.mulf %6, %163 : vector<16x4xf32>
    %165 = arith.addf %161, %164 : vector<16x4xf32>
    %166 = vector.extract_strided_slice %155 {offsets = [2, 0], sizes = [1, 4], strides = [1, 1]} : vector<5x4xf32> to vector<1x4xf32>
    %167 = vector.broadcast %166 : vector<1x4xf32> to vector<16x4xf32>
    %168 = arith.mulf %8, %167 : vector<16x4xf32>
    %169 = arith.addf %165, %168 : vector<16x4xf32>
    %170 = vector.extract_strided_slice %155 {offsets = [3, 0], sizes = [1, 4], strides = [1, 1]} : vector<5x4xf32> to vector<1x4xf32>
    %171 = vector.broadcast %170 : vector<1x4xf32> to vector<16x4xf32>
    %172 = arith.mulf %10, %171 : vector<16x4xf32>
    %173 = arith.addf %169, %172 : vector<16x4xf32>
    %174 = vector.extract_strided_slice %152 {offsets = [0, 0], sizes = [15, 4], strides = [1, 1]} : vector<16x4xf32> to vector<15x4xf32>
    %175 = tpu.concatenate %11, %174 in 0 : vector<1x4xf32>, vector<15x4xf32> -> vector<16x4xf32>
    %176 = arith.addf %173, %175 : vector<16x4xf32>
    %177 = arith.maximumf %176, %158 : vector<16x4xf32>
    %178 = arith.subf %176, %158 : vector<16x4xf32>
    %179 = arith.cmpf one, %178, %178 : vector<16x4xf32>
    %180 = arith.addf %176, %158 : vector<16x4xf32>
    %181 = math.absf %178 : vector<16x4xf32>
    %cst_26 = arith.constant 0.000000e+00 : f32
    %182 = vector.broadcast %cst_26 : f32 to vector<16x4xf32>
    %183 = arith.subf %182, %181 : vector<16x4xf32>
    %184 = math.exp %183 : vector<16x4xf32>
    %185 = math.log1p %184 : vector<16x4xf32>
    %186 = arith.addf %177, %185 : vector<16x4xf32>
    %187 = arith.select %179, %180, %186 : vector<16x4xi1>, vector<16x4xf32>
    %c5_i32 = arith.constant 5 : i32
    %188 = arith.index_cast %c5_i32 : i32 to index
    %c0_27 = arith.constant 0 : index
    %c0_28 = arith.constant 0 : index
    %189 = vector.load %arg2[%188, %c0_27, %c0_28] : memref<8x5x4xf32, #tpu.memory_space<vmem>>, vector<1x5x4xf32>
    %190 = vector.shape_cast %189 : vector<1x5x4xf32> to vector<5x4xf32>
    %191 = vector.extract_strided_slice %190 {offsets = [4, 0], sizes = [1, 4], strides = [1, 1]} : vector<5x4xf32> to vector<1x4xf32>
    %192 = vector.broadcast %191 : vector<1x4xf32> to vector<16x4xf32>
    %193 = arith.addf %192, %187 : vector<16x4xf32>
    %194 = vector.extract_strided_slice %190 {offsets = [0, 0], sizes = [1, 4], strides = [1, 1]} : vector<5x4xf32> to vector<1x4xf32>
    %195 = vector.broadcast %194 : vector<1x4xf32> to vector<16x4xf32>
    %196 = arith.mulf %4, %195 : vector<16x4xf32>
    %197 = vector.extract_strided_slice %190 {offsets = [1, 0], sizes = [1, 4], strides = [1, 1]} : vector<5x4xf32> to vector<1x4xf32>
    %198 = vector.broadcast %197 : vector<1x4xf32> to vector<16x4xf32>
    %199 = arith.mulf %6, %198 : vector<16x4xf32>
    %200 = arith.addf %196, %199 : vector<16x4xf32>
    %201 = vector.extract_strided_slice %190 {offsets = [2, 0], sizes = [1, 4], strides = [1, 1]} : vector<5x4xf32> to vector<1x4xf32>
    %202 = vector.broadcast %201 : vector<1x4xf32> to vector<16x4xf32>
    %203 = arith.mulf %8, %202 : vector<16x4xf32>
    %204 = arith.addf %200, %203 : vector<16x4xf32>
    %205 = vector.extract_strided_slice %190 {offsets = [3, 0], sizes = [1, 4], strides = [1, 1]} : vector<5x4xf32> to vector<1x4xf32>
    %206 = vector.broadcast %205 : vector<1x4xf32> to vector<16x4xf32>
    %207 = arith.mulf %10, %206 : vector<16x4xf32>
    %208 = arith.addf %204, %207 : vector<16x4xf32>
    %209 = vector.extract_strided_slice %187 {offsets = [0, 0], sizes = [15, 4], strides = [1, 1]} : vector<16x4xf32> to vector<15x4xf32>
    %210 = tpu.concatenate %11, %209 in 0 : vector<1x4xf32>, vector<15x4xf32> -> vector<16x4xf32>
    %211 = arith.addf %208, %210 : vector<16x4xf32>
    %212 = arith.maximumf %211, %193 : vector<16x4xf32>
    %213 = arith.subf %211, %193 : vector<16x4xf32>
    %214 = arith.cmpf one, %213, %213 : vector<16x4xf32>
    %215 = arith.addf %211, %193 : vector<16x4xf32>
    %216 = math.absf %213 : vector<16x4xf32>
    %cst_29 = arith.constant 0.000000e+00 : f32
    %217 = vector.broadcast %cst_29 : f32 to vector<16x4xf32>
    %218 = arith.subf %217, %216 : vector<16x4xf32>
    %219 = math.exp %218 : vector<16x4xf32>
    %220 = math.log1p %219 : vector<16x4xf32>
    %221 = arith.addf %212, %220 : vector<16x4xf32>
    %222 = arith.select %214, %215, %221 : vector<16x4xi1>, vector<16x4xf32>
    %c6_i32 = arith.constant 6 : i32
    %223 = arith.index_cast %c6_i32 : i32 to index
    %c0_30 = arith.constant 0 : index
    %c0_31 = arith.constant 0 : index
    %224 = vector.load %arg2[%223, %c0_30, %c0_31] : memref<8x5x4xf32, #tpu.memory_space<vmem>>, vector<1x5x4xf32>
    %225 = vector.shape_cast %224 : vector<1x5x4xf32> to vector<5x4xf32>
    %226 = vector.extract_strided_slice %225 {offsets = [4, 0], sizes = [1, 4], strides = [1, 1]} : vector<5x4xf32> to vector<1x4xf32>
    %227 = vector.broadcast %226 : vector<1x4xf32> to vector<16x4xf32>
    %228 = arith.addf %227, %222 : vector<16x4xf32>
    %229 = vector.extract_strided_slice %225 {offsets = [0, 0], sizes = [1, 4], strides = [1, 1]} : vector<5x4xf32> to vector<1x4xf32>
    %230 = vector.broadcast %229 : vector<1x4xf32> to vector<16x4xf32>
    %231 = arith.mulf %4, %230 : vector<16x4xf32>
    %232 = vector.extract_strided_slice %225 {offsets = [1, 0], sizes = [1, 4], strides = [1, 1]} : vector<5x4xf32> to vector<1x4xf32>
    %233 = vector.broadcast %232 : vector<1x4xf32> to vector<16x4xf32>
    %234 = arith.mulf %6, %233 : vector<16x4xf32>
    %235 = arith.addf %231, %234 : vector<16x4xf32>
    %236 = vector.extract_strided_slice %225 {offsets = [2, 0], sizes = [1, 4], strides = [1, 1]} : vector<5x4xf32> to vector<1x4xf32>
    %237 = vector.broadcast %236 : vector<1x4xf32> to vector<16x4xf32>
    %238 = arith.mulf %8, %237 : vector<16x4xf32>
    %239 = arith.addf %235, %238 : vector<16x4xf32>
    %240 = vector.extract_strided_slice %225 {offsets = [3, 0], sizes = [1, 4], strides = [1, 1]} : vector<5x4xf32> to vector<1x4xf32>
    %241 = vector.broadcast %240 : vector<1x4xf32> to vector<16x4xf32>
    %242 = arith.mulf %10, %241 : vector<16x4xf32>
    %243 = arith.addf %239, %242 : vector<16x4xf32>
    %244 = vector.extract_strided_slice %222 {offsets = [0, 0], sizes = [15, 4], strides = [1, 1]} : vector<16x4xf32> to vector<15x4xf32>
    %245 = tpu.concatenate %11, %244 in 0 : vector<1x4xf32>, vector<15x4xf32> -> vector<16x4xf32>
    %246 = arith.addf %243, %245 : vector<16x4xf32>
    %247 = arith.maximumf %246, %228 : vector<16x4xf32>
    %248 = arith.subf %246, %228 : vector<16x4xf32>
    %249 = arith.cmpf one, %248, %248 : vector<16x4xf32>
    %250 = arith.addf %246, %228 : vector<16x4xf32>
    %251 = math.absf %248 : vector<16x4xf32>
    %cst_32 = arith.constant 0.000000e+00 : f32
    %252 = vector.broadcast %cst_32 : f32 to vector<16x4xf32>
    %253 = arith.subf %252, %251 : vector<16x4xf32>
    %254 = math.exp %253 : vector<16x4xf32>
    %255 = math.log1p %254 : vector<16x4xf32>
    %256 = arith.addf %247, %255 : vector<16x4xf32>
    %257 = arith.select %249, %250, %256 : vector<16x4xi1>, vector<16x4xf32>
    %c7_i32 = arith.constant 7 : i32
    %258 = arith.index_cast %c7_i32 : i32 to index
    %c0_33 = arith.constant 0 : index
    %c0_34 = arith.constant 0 : index
    %259 = vector.load %arg2[%258, %c0_33, %c0_34] : memref<8x5x4xf32, #tpu.memory_space<vmem>>, vector<1x5x4xf32>
    %260 = vector.shape_cast %259 : vector<1x5x4xf32> to vector<5x4xf32>
    %261 = vector.extract_strided_slice %260 {offsets = [4, 0], sizes = [1, 4], strides = [1, 1]} : vector<5x4xf32> to vector<1x4xf32>
    %262 = vector.broadcast %261 : vector<1x4xf32> to vector<16x4xf32>
    %263 = arith.addf %262, %257 : vector<16x4xf32>
    %264 = vector.extract_strided_slice %260 {offsets = [0, 0], sizes = [1, 4], strides = [1, 1]} : vector<5x4xf32> to vector<1x4xf32>
    %265 = vector.broadcast %264 : vector<1x4xf32> to vector<16x4xf32>
    %266 = arith.mulf %4, %265 : vector<16x4xf32>
    %267 = vector.extract_strided_slice %260 {offsets = [1, 0], sizes = [1, 4], strides = [1, 1]} : vector<5x4xf32> to vector<1x4xf32>
    %268 = vector.broadcast %267 : vector<1x4xf32> to vector<16x4xf32>
    %269 = arith.mulf %6, %268 : vector<16x4xf32>
    %270 = arith.addf %266, %269 : vector<16x4xf32>
    %271 = vector.extract_strided_slice %260 {offsets = [2, 0], sizes = [1, 4], strides = [1, 1]} : vector<5x4xf32> to vector<1x4xf32>
    %272 = vector.broadcast %271 : vector<1x4xf32> to vector<16x4xf32>
    %273 = arith.mulf %8, %272 : vector<16x4xf32>
    %274 = arith.addf %270, %273 : vector<16x4xf32>
    %275 = vector.extract_strided_slice %260 {offsets = [3, 0], sizes = [1, 4], strides = [1, 1]} : vector<5x4xf32> to vector<1x4xf32>
    %276 = vector.broadcast %275 : vector<1x4xf32> to vector<16x4xf32>
    %277 = arith.mulf %10, %276 : vector<16x4xf32>
    %278 = arith.addf %274, %277 : vector<16x4xf32>
    %279 = vector.extract_strided_slice %257 {offsets = [0, 0], sizes = [15, 4], strides = [1, 1]} : vector<16x4xf32> to vector<15x4xf32>
    %280 = tpu.concatenate %11, %279 in 0 : vector<1x4xf32>, vector<15x4xf32> -> vector<16x4xf32>
    %281 = arith.addf %278, %280 : vector<16x4xf32>
    %282 = arith.maximumf %281, %263 : vector<16x4xf32>
    %283 = arith.subf %281, %263 : vector<16x4xf32>
    %284 = arith.cmpf one, %283, %283 : vector<16x4xf32>
    %285 = arith.addf %281, %263 : vector<16x4xf32>
    %286 = math.absf %283 : vector<16x4xf32>
    %cst_35 = arith.constant 0.000000e+00 : f32
    %287 = vector.broadcast %cst_35 : f32 to vector<16x4xf32>
    %288 = arith.subf %287, %286 : vector<16x4xf32>
    %289 = math.exp %288 : vector<16x4xf32>
    %290 = math.log1p %289 : vector<16x4xf32>
    %291 = arith.addf %282, %290 : vector<16x4xf32>
    %292 = arith.select %284, %285, %291 : vector<16x4xi1>, vector<16x4xf32>
    %c8_i32 = arith.constant 8 : i32
    %c0_36 = arith.constant 0 : index
    %c0_37 = arith.constant 0 : index
    %293 = vector.load %arg6[%c0_36, %c0_37] : memref<16x4xf32, #tpu.memory_space<vmem>>, vector<16x4xf32>
    tpu.vector_store %arg6[%c0_36, %c0_37], %292 {strides = array<i32>} : memref<16x4xf32, #tpu.memory_space<vmem>>, vector<16x4xf32>,
    %c2_i32_38 = arith.constant 2 : i32
    %294 = arith.cmpi eq, %arg1, %c2_i32_38 : i32
    %295 = arith.extui %294 : i1 to i32
    %c0_i32_39 = arith.constant 0 : i32
    %296 = arith.cmpi ne, %295, %c0_i32_39 : i32
    scf.if %296 {
      %c0_40 = arith.constant 0 : index
      %c0_41 = arith.constant 0 : index
      %297 = vector.load %arg8[%c0_40, %c0_41] : memref<16x4xf32, #tpu.memory_space<vmem>>, vector<16x4xf32>
      %c0_42 = arith.constant 0 : index
      %c0_43 = arith.constant 0 : index
      %298 = vector.load %arg6[%c0_42, %c0_43] : memref<16x4xf32, #tpu.memory_space<vmem>>, vector<16x4xf32>
      %299 = arith.mulf %297, %298 : vector<16x4xf32>
      %cst_44 = arith.constant dense<0.000000e+00> : vector<4xf32>
      %300 = vector.multi_reduction <add>, %299, %cst_44 [0] : vector<16x4xf32> to vector<4xf32>
      %301 = vector.shape_cast %300 : vector<4xf32> to vector<1x4xf32>
      %cst_45 = arith.constant 0.000000e+00 : f32
      %302 = vector.broadcast %cst_45 : f32 to vector<1x4xf32>
      %303 = arith.subf %302, %301 : vector<1x4xf32>
      %cst_46 = arith.constant 5.000000e-02 : f32
      %304 = vector.broadcast %cst_46 : f32 to vector<1x4xf32>
      %305 = arith.mulf %303, %304 : vector<1x4xf32>
      %c0_47 = arith.constant 0 : index
      %c0_48 = arith.constant 0 : index
      %306 = vector.load %arg5[%c0_47, %c0_48] : memref<1x4xf32, #tpu.memory_space<vmem>>, vector<1x4xf32>
      tpu.vector_store %arg5[%c0_47, %c0_48], %305 {strides = array<i32>} : memref<1x4xf32, #tpu.memory_space<vmem>>, vector<1x4xf32>,
    } else {
    }
    return
  }
  func.func @transform_0(%arg0: i32, %arg1: i32) -> (i32, i32, i32) {
    %c0_i32 = arith.constant 0 : i32
    %c0_i32_0 = arith.constant 0 : i32
    return %arg1, %c0_i32, %arg0 : i32, i32, i32
  }
  func.func @transform_1(%arg0: i32, %arg1: i32) -> (i32, i32) {
    %c0_i32 = arith.constant 0 : i32
    %c0_i32_0 = arith.constant 0 : i32
    return %c0_i32, %arg0 : i32, i32
  }
  func.func @transform_2(%arg0: i32, %arg1: i32) -> (i32, i32) {
    %c0_i32 = arith.constant 0 : i32
    %c0_i32_0 = arith.constant 0 : i32
    return %c0_i32, %arg0 : i32, i32
  }
  func.func @transform_3(%arg0: i32, %arg1: i32) -> (i32, i32) {
    %c0_i32 = arith.constant 0 : i32
    %c0_i32_0 = arith.constant 0 : i32
    return %c0_i32, %arg0 : i32, i32
  }
}

</mosaic_0001>

<bundles_post_ra>
// kernel: tpu_custom_call.1
= control target key start
LH: loop header
LB: loop body
LE: loop exit
PB: predicated region body
PF: predicated region fallthrough
CT: control target
= control target key end

     0   :  { %8 = vsyncpa [#allocation6], 0  ;;  %s1302_s12 = smov 0   ;;  %s1304_s13 = smov 0   ;;  %s1639_s0 = inlined_call_operand.vmem [shape: f32[24,5,4], index: 0, kind: input, shape index: {}]   ;;  %s1640_s1 = inlined_call_operand.vmem [shape: s32[16,4], index: 1, kind: input, shape index: {}]   ;;  %s1641_s2 = inlined_call_operand.vmem [shape: s32[1,4], index: 2, kind: input, shape index: {}]   ;;  %s1642_s3 = inlined_call_operand.hbm [shape: f32[1,4], index: 3, kind: output, shape index: {}]  }
   0x1   :  { %s1306_s14 = smov 0  }
   0x2 LB: > { %s1098_s15 = sadd.s32 4294967295, %s1277_s14   ;;  %s23_s16 = sadd.s32 1, %s1273_s13  ;;  %s1277_s14 = sphi %s1306_s14, %s14_s14   ;;  %s1273_s13 = sphi %s1304_s13, %s1659_s13   ;;  %s1269_s12 = sphi %s1302_s12, %s1658_s12  }
   0x3   : > { %p24_p0 = scmp.ge.s32.totalorder %s23_s16, 3  ;;  %p1103_p1 = scmp.ge.s32.totalorder %s1277_s14, 1 }
   0x4   : > { %p173_p2 = scmp.lt.s32.totalorder %s1277_s14, 4 }
   0x5   : > { %s1661_s16 = smov (%p24_p0, %s23_s16), 0 }
   0x6   : > { %p174_p3 = pnand %p1103_p1, %p173_p2 }
   0x7   : > { %s1104_s17 = sshll.u32 (!%p174_p3), %s1269_s12, 3  ;;  %p1106_p5 = scmp.ne.s32.totalorder (!%p174_p3), %s1269_s12, 0 }
   0x8   : > { %177 = sbr.rel (%p174_p3) target bundleno = 479 (0x1df), region = 32  ;;  %p203_p4 = scmp.lt.s32.totalorder (!%p174_p3), %s1104_s17, 23 }
   0xd   : > { %s1663_s17 = smov (!%p203_p4, %s1104_s17), 23  ;;  %221 = sbr.rel (%p1106_p5) target bundleno = 28 (0x1c), region = 36 }
   0xe   : > { %s1105_s18 = sshll.u32 %s1663_s17, 3 }
   0xf   : > { %s1327_s21 = scalar_lea.vmem %s1639_s0, %s1105_s18 }
  0x12   : > { %v222_v0 = vlaneseq  ;;  %vm229_vm0 = vcmask 31744   ;;  %v232_v1 = vld [vmem:[%s1640_s1] sm:$0xff]  ;;  %v233_v2 = vld [vmem:[%s1640_s1 + $0x8] sm:$0xff]  ;;  %v1279_v3 = vmov -1e+30   ;;  %v1280_v5 = vmov 0.0  }
  0x13   : > { %231 = vst.msk [vmem:[#allocation2 + $0x8] sm:$0xff] %vm229_vm0, %v1279_v3  ;;  %vm234_vm1 = vcmp.eq.s32.totalorder %v232_v1, 0  ;;  %vm235_vm2 = vcmp.eq.s32.totalorder %v233_v2, 0  ;;  %vm242_vm3 = vcmp.eq.s32.totalorder %v232_v1, 1  ;;  %vm243_vm4 = vcmp.eq.s32.totalorder %v233_v2, 1 }
  0x14   : > { %v223_v4 = vshrl.u32 %v222_v0, 7  ;;  %v1107_v6 = vsel %vm234_vm1, 1.0, %v1280_v5  ;;  %v1108_v7 = vsel %vm235_vm2, 1.0, %v1280_v5  ;;  %v1109_v8 = vsel %vm242_vm3, 1.0, %v1280_v5  ;;  %v1115_v9 = vld [vmem:[%s1641_s2] ss:$0 sm:$0xff] }
  0x15   : > { %240 = vst.msk [vmem:[#allocation3] sm:$0xff] %vm229_vm0, %v1107_v6  ;;  %241 = vst.msk [vmem:[#allocation3 + $0x8] sm:$0xff] %vm229_vm0, %v1108_v7  ;;  %v1110_v10 = vsel %vm243_vm4, 1.0, %v1280_v5  ;;  %vm251_vm5 = vcmp.eq.s32.totalorder %v232_v1, 2  ;;  %vm252_vm6 = vcmp.eq.s32.totalorder %v233_v2, 2  ;;  %vm260_vm7 = vcmp.eq.s32.totalorder %v232_v1, 3 }
  0x16   : > { %249 = vst.msk [vmem:[#allocation3 + $0x10] sm:$0xff] %vm229_vm0, %v1109_v8  ;;  %vm225_vm8 = vcmp.eq.s32.totalorder %v223_v4, 0  ;;  %250 = vst.msk [vmem:[#allocation3 + $0x18] sm:$0xff] %vm229_vm0, %v1110_v10  ;;  %v1111_v11 = vsel %vm251_vm5, 1.0, %v1280_v5  ;;  %v1112_v12 = vsel %vm252_vm6, 1.0, %v1280_v5  ;;  %v1113_v13 = vsel %vm260_vm7, 1.0, %v1280_v5 }
  0x17   : > { %v227_v14 = vsel %vm225_vm8, 0.0, %v1279_v3  ;;  %258 = vst.msk [vmem:[#allocation3 + $0x20] sm:$0xff] %vm229_vm0, %v1111_v11  ;;  %259 = vst.msk [vmem:[#allocation3 + $0x28] sm:$0xff] %vm229_vm0, %v1112_v12  ;;  %vm261_vm9 = vcmp.eq.s32.totalorder %v233_v2, 3  ;;  %vm274_vm10 = vcmp.eq.s32.totalorder %v223_v4, %v1115_v9  ;;  %v224_v15 = vadd.s32 8, %v223_v4 }
  0x18   : > { %267 = vst.msk [vmem:[#allocation3 + $0x30] sm:$0xff] %vm229_vm0, %v1113_v13  ;;  %230 = vst.msk [vmem:[#allocation2] sm:$0xff] %vm229_vm0, %v227_v14  ;;  %v1114_v16 = vsel %vm261_vm9, 1.0, %v1280_v5  ;;  %v1116_v17 = vsel %vm274_vm10, 1.0, %v1280_v5 }
  0x19   : > { %268 = vst.msk [vmem:[#allocation3 + $0x38] sm:$0xff] %vm229_vm0, %v1114_v16  ;;  %280 = vst.msk [vmem:[#allocation4] sm:$0xff] %vm229_vm0, %v1116_v17  ;;  %vm275_vm11 = vcmp.eq.s32.totalorder %v224_v15, %v1115_v9 }
  0x1a   : > { %v1117_v18 = vsel %vm275_vm11, 1.0, %v1280_v5 }
  0x1b   : > { %281 = vst.msk [vmem:[#allocation4 + $0x8] sm:$0xff] %vm229_vm0, %v1117_v18 }
  0x1c PF: > { %v296_v19 = vlaneseq  ;;  %v295_v21 = vld [vmem:[%s1327_s21] sm:$0x1f]  ;;  %v1358_v25 = vld [vmem:[#allocation3] sm:$0xff]  ;;  %v1360_v26 = vld [vmem:[#allocation3 + $0x8] sm:$0xff]  ;;  %vm334_vm12 = vcmask 1040384   ;;  %p1125_p6 = scmp.ne.s32.totalorder %s1269_s12, 2 }
  0x1d   : > { %v1362_v27 = vld [vmem:[#allocation3 + $0x10] sm:$0xff]  ;;  %v1366_v29 = vld [vmem:[#allocation3 + $0x18] sm:$0xff] }
  0x1e   : > { %v297_v20 = vshrl.u32 %v296_v19, 7  ;;  %v1368_v30 = vld [vmem:[#allocation3 + $0x20] sm:$0xff]  ;;  %v1370_v31 = vld [vmem:[#allocation3 + $0x28] sm:$0xff]  ;;  %v294_v37 = vld [vmem:[#allocation2 + $0x8] sm:$0xff] }
  0x1f   : > { %v293_v36 = vld [vmem:[#allocation2] sm:$0xff]  ;;  %v336_v49 = vrot.slane %v294_v37, 7  ;;  %v1118_v12 = vld [vmem:[%s1327_s21 + $0x8] sm:$0x1f] }
  0x20   : > { %v1352_v22 = vsub.s32 0, %v297_v20  ;;  %v1354_v23 = vsub.s32 1, %v297_v20  ;;  %v1356_v24 = vsub.s32 2, %v297_v20  ;;  %v1364_v28 = vsub.s32 3, %v297_v20  ;;  %v1378_v39 = vld [vmem:[#allocation3 + $0x30] sm:$0xff]  ;;  %v1380_v40 = vld [vmem:[#allocation3 + $0x38] sm:$0xff] }
  0x21   : > { %v1372_v32 = vsub.s32 4, %v297_v20  ;;  %v335_v48 = vrot.slane %v293_v36, 7 }
  0x22   : > { %v305_v33 = vrot.slane %v295_v21, %v1352_v22  ;;  %v311_v34 = vrot.slane %v295_v21, %v1354_v23  ;;  %v319_v35 = vrot.slane %v295_v21, %v1356_v24  ;;  %v327_v38 = vrot.slane %v295_v21, %v1364_v28 }
  0x23   : > { %v299_v47 = vrot.slane %v295_v21, %v1372_v32  ;;  %v337_v56 = vsel %vm334_vm12, %v335_v48, %v336_v49  ;;  %v340_v57 = vsel %vm334_vm12, -1e+30, %v335_v48  ;;  %v392_v13 = vrot.slane %v1118_v12, %v1352_v22 }
  0x24   : > { %v306_v41 = vmul.f32 %v305_v33, %v1358_v25  ;;  %v307_v42 = vmul.f32 %v305_v33, %v1360_v26  ;;  %v312_v43 = vmul.f32 %v311_v34, %v1362_v27  ;;  %v313_v44 = vmul.f32 %v311_v34, %v1366_v29 }
  0x25   : > { %v320_v45 = vmul.f32 %v319_v35, %v1368_v30  ;;  %v321_v46 = vmul.f32 %v319_v35, %v1370_v31  ;;  %v328_v52 = vmul.f32 %v327_v38, %v1378_v39  ;;  %v329_v53 = vmul.f32 %v327_v38, %v1380_v40 }
  0x26   : > { %v314_v50 = vadd.f32 %v312_v43, %v306_v41  ;;  %v315_v51 = vadd.f32 %v313_v44, %v307_v42  ;;  %v300_v58 = vadd.f32 %v299_v47, %v293_v36  ;;  %v1393_v59 = vadd.f32 %v299_v47, %v294_v37 }
  0x27   : > { %v398_v14 = vrot.slane %v1118_v12, %v1354_v23  ;;  %v393_v17 = vmul.f32 %v392_v13, %v1358_v25  ;;  %v406_v19 = vrot.slane %v1118_v12, %v1356_v24  ;;  %v394_v21 = vmul.f32 %v392_v13, %v1360_v26 }
  0x28   : > { %v322_v54 = vadd.f32 %v320_v45, %v314_v50  ;;  %v323_v55 = vadd.f32 %v321_v46, %v315_v51  ;;  %v414_v37 = vrot.slane %v1118_v12, %v1364_v28 }
  0x29   : > { %v399_v18 = vmul.f32 %v398_v14, %v1362_v27  ;;  %v400_v33 = vmul.f32 %v398_v14, %v1366_v29  ;;  %v407_v41 = vmul.f32 %v406_v19, %v1368_v30  ;;  %v408_v44 = vmul.f32 %v406_v19, %v1370_v31 }
  0x2a   : > { %v330_v60 = vadd.f32 %v328_v52, %v322_v54  ;;  %v331_v61 = vadd.f32 %v329_v53, %v323_v55  ;;  %v415_v52 = vmul.f32 %v414_v37, %v1378_v39 }
  0x2b   : > { %v401_v38 = vadd.f32 %v399_v18, %v393_v17  ;;  %v402_v43 = vadd.f32 %v400_v33, %v394_v21 }
  0x2c   : > { %v341_v62 = vadd.f32 %v340_v57, %v330_v60  ;;  %v342_v63 = vadd.f32 %v337_v56, %v331_v61  ;;  %v416_v56 = vmul.f32 %v414_v37, %v1380_v40 }
  0x2d   : > { %v409_v55 = vadd.f32 %v407_v41, %v401_v38  ;;  %v410_v61 = vadd.f32 %v408_v44, %v402_v43 }
  0x2e   : > { %v345_v0 = vsub.f32 %v341_v62, %v300_v58  ;;  %v346_v1 = vsub.f32 %v342_v63, %v1393_v59  ;;  %v343_v46 = vmax.f32 %v341_v62, %v300_v58  ;;  %v344_v50 = vmax.f32 %v342_v63, %v1393_v59 }
  0x2f   : > { %v349_v53 = vadd.f32 %v341_v62, %v300_v58  ;;  %v350_v57 = vadd.f32 %v342_v63, %v1393_v59  ;;  %v418_v62 = vadd.f32 %v416_v56, %v410_v61 }
  0x30   : > { %v351_v2 = vand.u32 2147483647, %v345_v0  ;;  %v352_v3 = vand.u32 2147483647, %v346_v1  ;;  %vm347_vm15 = vcmp.ne.f32.partialorder %v345_v0, %v345_v0  ;;  %vm348_vm0 = vcmp.ne.f32.partialorder %v346_v1, %v346_v1 }
  0x32   : > { %v353_v4 = vsub.f32 0.0, %v351_v2  ;;  %v354_v5 = vsub.f32 0.0, %v352_v3 }
  0x34   : > { %v355_v6 = vmul.f32 1.442695, %v353_v4  ;;  %v357_v7 = vmul.f32 1.442695, %v354_v5  ;;  %v386_v4 = vrot.slane %v1118_v12, %v1372_v32 }
  0x36   : > { %1163 = vpow2.f32 %v355_v6 }
  0x37   : > { %1165 = vpow2.f32 %v357_v7  ;;  %v417_v7 = vadd.f32 %v415_v52, %v409_v55 }
  0x43   : > { %v1164_v8 = vpop.eup %1163 }
  0x44   : > { %v1166_v9 = vpop.eup %1165  ;;  %v359_v10 = vadd.f32 1.0, %v1164_v8  ;;  %v362_v15 = vmul.f32 -0.5, %v1164_v8  ;;  %v365_v34 = vand.u32 2147483647, %v1164_v8 }
  0x45   : > { %v368_v11 = vadd.f32 1.0, %v1166_v9  ;;  %v371_v16 = vmul.f32 -0.5, %v1166_v9  ;;  %v374_v36 = vand.u32 2147483647, %v1166_v9 }
  0x46   : > { %1167 = vlog2.f32 %v359_v10  ;;  %v363_v20 = vadd.f32 1.0, %v362_v15  ;;  %vm1407_vm13 = vcmp.lt.f32.partialorder %v365_v34, 0.0004427343 }
  0x47   : > { %1169 = vlog2.f32 %v368_v11  ;;  %v372_v35 = vadd.f32 1.0, %v371_v16  ;;  %vm375_vm14 = vcmp.lt.f32.partialorder %v374_v36, 0.0004427343 }
  0x48   : > { %v364_v42 = vmul.f32 %v1164_v8, %v363_v20 }
  0x49   : > { %v373_v48 = vmul.f32 %v1166_v9, %v372_v35  ;;  %v1119_v35 = vld [vmem:[%s1327_s21 + $0x10] sm:$0x1f] }
  0x4a   : > { %v478_v36 = vrot.slane %v1119_v35, %v1352_v22  ;;  %v484_v37 = vrot.slane %v1119_v35, %v1354_v23  ;;  %v492_v44 = vrot.slane %v1119_v35, %v1356_v24 }
  0x4c   : > { %v485_v43 = vmul.f32 %v484_v37, %v1362_v27  ;;  %v486_v47 = vmul.f32 %v484_v37, %v1366_v29  ;;  %v494_v56 = vmul.f32 %v492_v44, %v1370_v31 }
  0x53   : > { %v1168_v45 = vpop.eup %1167 }
  0x54   : > { %v1170_v49 = vpop.eup %1169  ;;  %v361_v51 = vmul.f32 0.6931472, %v1168_v45 }
  0x55   : > { %v370_v54 = vmul.f32 0.6931472, %v1170_v49 }
  0x56   : > { %v367_v60 = vsel %vm1407_vm13, %v364_v42, %v361_v51  ;;  %v479_v42 = vmul.f32 %v478_v36, %v1358_v25  ;;  %v500_v51 = vrot.slane %v1119_v35, %v1364_v28 }
  0x57   : > { %v376_v2 = vsel %vm375_vm14, %v373_v48, %v370_v54  ;;  %v377_v3 = vadd.f32 %v367_v60, %v343_v46  ;;  %v480_v46 = vmul.f32 %v478_v36, %v1360_v26 }
  0x58   : > { %v378_v5 = vadd.f32 %v376_v2, %v344_v50  ;;  %v487_v52 = vadd.f32 %v485_v43, %v479_v42 }
  0x59   : > { %v379_v6 = vsel %vm347_vm15, %v349_v53, %v377_v3  ;;  %v493_v53 = vmul.f32 %v492_v44, %v1368_v30  ;;  %v488_v55 = vadd.f32 %v486_v47, %v480_v46 }
  0x5a   : > { %v380_v58 = vsel %vm348_vm0, %v350_v57, %v378_v5  ;;  %v421_v8 = vrot.slane %v379_v6, 7  ;;  %v1418_v9 = vadd.f32 %v386_v4, %v379_v6  ;;  %v501_v6 = vmul.f32 %v500_v51, %v1378_v39 }
  0x5b   : > { %v422_v0 = vrot.slane %v380_v58, 7  ;;  %v1420_v10 = vadd.f32 %v386_v4, %v380_v58 }
  0x5c   : > { %v426_v59 = vsel %vm334_vm12, -1e+30, %v421_v8 }
  0x5d   : > { %v423_v63 = vsel %vm334_vm12, %v421_v8, %v422_v0  ;;  %v427_v1 = vadd.f32 %v426_v59, %v417_v7  ;;  %v502_v8 = vmul.f32 %v500_v51, %v1380_v40 }
  0x5e   : > { %v428_v11 = vadd.f32 %v423_v63, %v418_v62  ;;  %v495_v62 = vadd.f32 %v493_v53, %v487_v52  ;;  %v496_v63 = vadd.f32 %v494_v56, %v488_v55 }
  0x5f   : > { %v431_v12 = vsub.f32 %v427_v1, %v1418_v9  ;;  %v429_v60 = vmax.f32 %v427_v1, %v1418_v9  ;;  %v435_v7 = vadd.f32 %v427_v1, %v1418_v9 }
  0x60   : > { %v432_v13 = vsub.f32 %v428_v11, %v1420_v10  ;;  %v430_v4 = vmax.f32 %v428_v11, %v1420_v10  ;;  %v436_v0 = vadd.f32 %v428_v11, %v1420_v10  ;;  %v504_v1 = vadd.f32 %v502_v8, %v496_v63 }
  0x61   : > { %v437_v14 = vand.u32 2147483647, %v431_v12  ;;  %vm433_vm3 = vcmp.ne.f32.partialorder %v431_v12, %v431_v12 }
  0x62   : > { %v438_v15 = vand.u32 2147483647, %v432_v13  ;;  %vm434_vm4 = vcmp.ne.f32.partialorder %v432_v13, %v432_v13 }
  0x63   : > { %v439_v16 = vsub.f32 0.0, %v437_v14 }
  0x64   : > { %v440_v17 = vsub.f32 0.0, %v438_v15 }
  0x65   : > { %v441_v18 = vmul.f32 1.442695, %v439_v16  ;;  %v472_v16 = vrot.slane %v1119_v35, %v1372_v32 }
  0x66   : > { %v443_v19 = vmul.f32 1.442695, %v440_v17 }
  0x67   : > { %1171 = vpow2.f32 %v441_v18 }
  0x68   : > { %1173 = vpow2.f32 %v443_v19  ;;  %v503_v19 = vadd.f32 %v501_v6, %v495_v62 }
  0x74   : > { %v1172_v20 = vpop.eup %1171 }
  0x75   : > { %v1174_v21 = vpop.eup %1173  ;;  %v445_v33 = vadd.f32 1.0, %v1172_v20  ;;  %v448_v38 = vmul.f32 -0.5, %v1172_v20  ;;  %v451_v48 = vand.u32 2147483647, %v1172_v20 }
  0x76   : > { %v454_v34 = vadd.f32 1.0, %v1174_v21  ;;  %v457_v41 = vmul.f32 -0.5, %v1174_v21  ;;  %v460_v50 = vand.u32 2147483647, %v1174_v21 }
  0x77   : > { %1175 = vlog2.f32 %v445_v33  ;;  %v449_v45 = vadd.f32 1.0, %v448_v38  ;;  %vm1438_vm1 = vcmp.lt.f32.partialorder %v451_v48, 0.0004427343 }
  0x78   : > { %1177 = vlog2.f32 %v454_v34  ;;  %v458_v49 = vadd.f32 1.0, %v457_v41  ;;  %vm461_vm2 = vcmp.lt.f32.partialorder %v460_v50, 0.0004427343 }
  0x79   : > { %v450_v54 = vmul.f32 %v1172_v20, %v449_v45 }
  0x7a   : > { %v459_v2 = vmul.f32 %v1174_v21, %v458_v49  ;;  %v1120_v49 = vld [vmem:[%s1327_s21 + $0x18] sm:$0x1f] }
  0x7b   : > { %v564_v50 = vrot.slane %v1120_v49, %v1352_v22  ;;  %v570_v51 = vrot.slane %v1120_v49, %v1354_v23  ;;  %v578_v56 = vrot.slane %v1120_v49, %v1356_v24 }
  0x7d   : > { %v571_v55 = vmul.f32 %v570_v51, %v1362_v27  ;;  %v572_v61 = vmul.f32 %v570_v51, %v1366_v29  ;;  %v580_v8 = vmul.f32 %v578_v56, %v1370_v31 }
  0x84   : > { %v1176_v57 = vpop.eup %1175 }
  0x85   : > { %v1178_v3 = vpop.eup %1177  ;;  %v447_v5 = vmul.f32 0.6931472, %v1176_v57 }
  0x86   : > { %v456_v58 = vmul.f32 0.6931472, %v1178_v3 }
  0x87   : > { %v453_v59 = vsel %vm1438_vm1, %v450_v54, %v447_v5  ;;  %v565_v54 = vmul.f32 %v564_v50, %v1358_v25  ;;  %v586_v5 = vrot.slane %v1120_v49, %v1364_v28 }
  0x88   : > { %v462_v14 = vsel %vm461_vm2, %v459_v2, %v456_v58  ;;  %v463_v15 = vadd.f32 %v453_v59, %v429_v60  ;;  %v566_v60 = vmul.f32 %v564_v50, %v1360_v26 }
  0x89   : > { %v464_v17 = vadd.f32 %v462_v14, %v430_v4  ;;  %v573_v6 = vadd.f32 %v571_v55, %v565_v54 }
  0x8a   : > { %v465_v18 = vsel %vm433_vm3, %v435_v7, %v463_v15  ;;  %v579_v7 = vmul.f32 %v578_v56, %v1368_v30  ;;  %v574_v62 = vadd.f32 %v572_v61, %v566_v60 }
  0x8b   : > { %v466_v9 = vsel %vm434_vm4, %v436_v0, %v464_v17  ;;  %v507_v20 = vrot.slane %v465_v18, 7  ;;  %v1450_v21 = vadd.f32 %v472_v16, %v465_v18  ;;  %v587_v18 = vmul.f32 %v586_v5, %v1378_v39 }
  0x8c   : > { %v508_v12 = vrot.slane %v466_v9, 7  ;;  %v1452_v33 = vadd.f32 %v472_v16, %v466_v9 }
  0x8d   : > { %v512_v10 = vsel %vm334_vm12, -1e+30, %v507_v20 }
  0x8e   : > { %v509_v11 = vsel %vm334_vm12, %v507_v20, %v508_v12  ;;  %v513_v13 = vadd.f32 %v512_v10, %v503_v19  ;;  %v588_v20 = vmul.f32 %v586_v5, %v1380_v40 }
  0x8f   : > { %v514_v34 = vadd.f32 %v509_v11, %v504_v1  ;;  %v581_v1 = vadd.f32 %v579_v7, %v573_v6  ;;  %v582_v11 = vadd.f32 %v580_v8, %v574_v62 }
  0x90   : > { %v517_v35 = vsub.f32 %v513_v13, %v1450_v21  ;;  %v515_v59 = vmax.f32 %v513_v13, %v1450_v21  ;;  %v521_v19 = vadd.f32 %v513_v13, %v1450_v21 }
  0x91   : > { %v518_v36 = vsub.f32 %v514_v34, %v1452_v33  ;;  %v516_v16 = vmax.f32 %v514_v34, %v1452_v33  ;;  %v522_v12 = vadd.f32 %v514_v34, %v1452_v33  ;;  %v590_v13 = vadd.f32 %v588_v20, %v582_v11 }
  0x92   : > { %v523_v37 = vand.u32 2147483647, %v517_v35  ;;  %vm519_vm7 = vcmp.ne.f32.partialorder %v517_v35, %v517_v35 }
  0x93   : > { %v524_v38 = vand.u32 2147483647, %v518_v36  ;;  %vm520_vm8 = vcmp.ne.f32.partialorder %v518_v36, %v518_v36 }
  0x94   : > { %v525_v41 = vsub.f32 0.0, %v523_v37 }
  0x95   : > { %v526_v42 = vsub.f32 0.0, %v524_v38 }
  0x96   : > { %v527_v43 = vmul.f32 1.442695, %v525_v41  ;;  %v558_v41 = vrot.slane %v1120_v49, %v1372_v32 }
  0x97   : > { %v529_v44 = vmul.f32 1.442695, %v526_v42 }
  0x98   : > { %1179 = vpow2.f32 %v527_v43 }
  0x99   : > { %1181 = vpow2.f32 %v529_v44  ;;  %v589_v44 = vadd.f32 %v587_v18, %v581_v1 }
  0xa5   : > { %v1180_v45 = vpop.eup %1179 }
  0xa6   : > { %v1182_v46 = vpop.eup %1181  ;;  %v531_v47 = vadd.f32 1.0, %v1180_v45  ;;  %v534_v52 = vmul.f32 -0.5, %v1180_v45  ;;  %v537_v2 = vand.u32 2147483647, %v1180_v45 }
  0xa7   : > { %v540_v48 = vadd.f32 1.0, %v1182_v46  ;;  %v543_v53 = vmul.f32 -0.5, %v1182_v46  ;;  %v546_v4 = vand.u32 2147483647, %v1182_v46 }
  0xa8   : > { %1183 = vlog2.f32 %v531_v47  ;;  %v535_v57 = vadd.f32 1.0, %v534_v52  ;;  %vm1470_vm5 = vcmp.lt.f32.partialorder %v537_v2, 0.0004427343 }
  0xa9   : > { %1185 = vlog2.f32 %v540_v48  ;;  %v544_v3 = vadd.f32 1.0, %v543_v53  ;;  %vm547_vm6 = vcmp.lt.f32.partialorder %v546_v4, 0.0004427343 }
  0xaa   : > { %v536_v58 = vmul.f32 %v1180_v45, %v535_v57 }
  0xab   : > { %v545_v14 = vmul.f32 %v1182_v46, %v544_v3  ;;  %v1121_v3 = vld [vmem:[%s1327_s21 + $0x20] sm:$0x1f] }
  0xac   : > { %v650_v4 = vrot.slane %v1121_v3, %v1352_v22  ;;  %v656_v5 = vrot.slane %v1121_v3, %v1354_v23  ;;  %v664_v8 = vrot.slane %v1121_v3, %v1356_v24 }
  0xae   : > { %v657_v62 = vmul.f32 %v656_v5, %v1362_v27  ;;  %v658_v63 = vmul.f32 %v656_v5, %v1366_v29  ;;  %v666_v20 = vmul.f32 %v664_v8, %v1370_v31 }
  0xb5   : > { %v1184_v0 = vpop.eup %1183 }
  0xb6   : > { %v1186_v15 = vpop.eup %1185  ;;  %v533_v17 = vmul.f32 0.6931472, %v1184_v0 }
  0xb7   : > { %v542_v9 = vmul.f32 0.6931472, %v1186_v15 }
  0xb8   : > { %v539_v10 = vsel %vm1470_vm5, %v536_v58, %v533_v17  ;;  %v651_v58 = vmul.f32 %v650_v4, %v1358_v25  ;;  %v672_v17 = vrot.slane %v1121_v3, %v1364_v28 }
  0xb9   : > { %v548_v37 = vsel %vm547_vm6, %v545_v14, %v542_v9  ;;  %v549_v38 = vadd.f32 %v539_v10, %v515_v59  ;;  %v652_v59 = vmul.f32 %v650_v4, %v1360_v26 }
  0xba   : > { %v550_v42 = vadd.f32 %v548_v37, %v516_v16  ;;  %v659_v18 = vadd.f32 %v657_v62, %v651_v58 }
  0xbb   : > { %v551_v43 = vsel %vm519_vm7, %v521_v19, %v549_v38  ;;  %v665_v19 = vmul.f32 %v664_v8, %v1368_v30  ;;  %v660_v1 = vadd.f32 %v658_v63, %v652_v59 }
  0xbc   : > { %v552_v21 = vsel %vm520_vm8, %v522_v12, %v550_v42  ;;  %v593_v45 = vrot.slane %v551_v43, 7  ;;  %v1482_v46 = vadd.f32 %v558_v41, %v551_v43  ;;  %v673_v43 = vmul.f32 %v672_v17, %v1378_v39 }
  0xbd   : > { %v594_v35 = vrot.slane %v552_v21, 7  ;;  %v1484_v47 = vadd.f32 %v558_v41, %v552_v21 }
  0xbe   : > { %v598_v33 = vsel %vm334_vm12, -1e+30, %v593_v45 }
  0xbf   : > { %v595_v34 = vsel %vm334_vm12, %v593_v45, %v594_v35  ;;  %v599_v36 = vadd.f32 %v598_v33, %v589_v44  ;;  %v674_v45 = vmul.f32 %v672_v17, %v1380_v40 }
  0xc0   : > { %v600_v48 = vadd.f32 %v595_v34, %v590_v13  ;;  %v667_v13 = vadd.f32 %v665_v19, %v659_v18  ;;  %v668_v34 = vadd.f32 %v666_v20, %v660_v1 }
  0xc1   : > { %v603_v49 = vsub.f32 %v599_v36, %v1482_v46  ;;  %v601_v10 = vmax.f32 %v599_v36, %v1482_v46  ;;  %v607_v44 = vadd.f32 %v599_v36, %v1482_v46 }
  0xc2   : > { %v604_v50 = vsub.f32 %v600_v48, %v1484_v47  ;;  %v602_v41 = vmax.f32 %v600_v48, %v1484_v47  ;;  %v608_v35 = vadd.f32 %v600_v48, %v1484_v47  ;;  %v676_v36 = vadd.f32 %v674_v45, %v668_v34 }
  0xc3   : > { %v609_v51 = vand.u32 2147483647, %v603_v49  ;;  %vm605_vm11 = vcmp.ne.f32.partialorder %v603_v49, %v603_v49 }
  0xc4   : > { %v610_v52 = vand.u32 2147483647, %v604_v50  ;;  %vm606_vm13 = vcmp.ne.f32.partialorder %v604_v50, %v604_v50 }
  0xc5   : > { %v611_v53 = vsub.f32 0.0, %v609_v51 }
  0xc6   : > { %v612_v54 = vsub.f32 0.0, %v610_v52 }
  0xc7   : > { %v613_v55 = vmul.f32 1.442695, %v611_v53  ;;  %v644_v53 = vrot.slane %v1121_v3, %v1372_v32 }
  0xc8   : > { %v615_v56 = vmul.f32 1.442695, %v612_v54 }
  0xc9   : > { %1187 = vpow2.f32 %v613_v55 }
  0xca   : > { %1189 = vpow2.f32 %v615_v56  ;;  %v675_v56 = vadd.f32 %v673_v43, %v667_v13 }
  0xd6   : > { %v1188_v57 = vpop.eup %1187 }
  0xd7   : > { %v1190_v60 = vpop.eup %1189  ;;  %v617_v61 = vadd.f32 1.0, %v1188_v57  ;;  %v620_v6 = vmul.f32 -0.5, %v1188_v57  ;;  %v623_v14 = vand.u32 2147483647, %v1188_v57 }
  0xd8   : > { %v626_v2 = vadd.f32 1.0, %v1190_v60  ;;  %v629_v7 = vmul.f32 -0.5, %v1190_v60  ;;  %v632_v16 = vand.u32 2147483647, %v1190_v60 }
  0xd9   : > { %1191 = vlog2.f32 %v617_v61  ;;  %v621_v0 = vadd.f32 1.0, %v620_v6  ;;  %vm1502_vm9 = vcmp.lt.f32.partialorder %v623_v14, 0.0004427343 }
  0xda   : > { %1193 = vlog2.f32 %v626_v2  ;;  %v630_v15 = vadd.f32 1.0, %v629_v7  ;;  %vm633_vm10 = vcmp.lt.f32.partialorder %v632_v16, 0.0004427343 }
  0xdb   : > { %v622_v9 = vmul.f32 %v1188_v57, %v621_v0 }
  0xdc   : > { %v631_v37 = vmul.f32 %v1190_v60, %v630_v15  ;;  %v1122_v15 = vld [vmem:[%s1327_s21 + $0x28] sm:$0x1f] }
  0xdd   : > { %v736_v16 = vrot.slane %v1122_v15, %v1352_v22  ;;  %v742_v17 = vrot.slane %v1122_v15, %v1354_v23  ;;  %v750_v20 = vrot.slane %v1122_v15, %v1356_v24 }
  0xdf   : > { %v743_v1 = vmul.f32 %v742_v17, %v1362_v27  ;;  %v744_v11 = vmul.f32 %v742_v17, %v1366_v29  ;;  %v752_v45 = vmul.f32 %v750_v20, %v1370_v31 }
  0xe6   : > { %v1192_v12 = vpop.eup %1191 }
  0xe7   : > { %v1194_v38 = vpop.eup %1193  ;;  %v619_v42 = vmul.f32 0.6931472, %v1192_v12 }
  0xe8   : > { %v628_v21 = vmul.f32 0.6931472, %v1194_v38 }
  0xe9   : > { %v625_v33 = vsel %vm1502_vm9, %v622_v9, %v619_v42  ;;  %v737_v9 = vmul.f32 %v736_v16, %v1358_v25  ;;  %v758_v42 = vrot.slane %v1122_v15, %v1364_v28 }
  0xea   : > { %v634_v51 = vsel %vm633_vm10, %v631_v37, %v628_v21  ;;  %v635_v52 = vadd.f32 %v625_v33, %v601_v10  ;;  %v738_v10 = vmul.f32 %v736_v16, %v1360_v26 }
  0xeb   : > { %v636_v54 = vadd.f32 %v634_v51, %v602_v41  ;;  %v745_v43 = vadd.f32 %v743_v1, %v737_v9 }
  0xec   : > { %v637_v55 = vsel %vm605_vm11, %v607_v44, %v635_v52  ;;  %v751_v44 = vmul.f32 %v750_v20, %v1368_v30  ;;  %v746_v13 = vadd.f32 %v744_v11, %v738_v10 }
  0xed   : > { %v638_v46 = vsel %vm606_vm13, %v608_v35, %v636_v54  ;;  %v679_v57 = vrot.slane %v637_v55, 7  ;;  %v1514_v60 = vadd.f32 %v644_v53, %v637_v55  ;;  %v759_v55 = vmul.f32 %v758_v42, %v1378_v39 }
  0xee   : > { %v680_v49 = vrot.slane %v638_v46, 7  ;;  %v1516_v61 = vadd.f32 %v644_v53, %v638_v46 }
  0xef   : > { %v684_v47 = vsel %vm334_vm12, -1e+30, %v679_v57 }
  0xf0   : > { %v681_v48 = vsel %vm334_vm12, %v679_v57, %v680_v49  ;;  %v685_v50 = vadd.f32 %v684_v47, %v675_v56  ;;  %v760_v57 = vmul.f32 %v758_v42, %v1380_v40 }
  0xf1   : > { %v686_v2 = vadd.f32 %v681_v48, %v676_v36  ;;  %v753_v36 = vadd.f32 %v751_v44, %v745_v43  ;;  %v754_v48 = vadd.f32 %v752_v45, %v746_v13 }
  0xf2   : > { %v689_v3 = vsub.f32 %v685_v50, %v1514_v60  ;;  %v687_v33 = vmax.f32 %v685_v50, %v1514_v60  ;;  %v693_v56 = vadd.f32 %v685_v50, %v1514_v60 }
  0xf3   : > { %v690_v4 = vsub.f32 %v686_v2, %v1516_v61  ;;  %v688_v53 = vmax.f32 %v686_v2, %v1516_v61  ;;  %v694_v49 = vadd.f32 %v686_v2, %v1516_v61  ;;  %v762_v50 = vadd.f32 %v760_v57, %v754_v48 }
  0xf4   : > { %v695_v5 = vand.u32 2147483647, %v689_v3  ;;  %vm691_vm0 = vcmp.ne.f32.partialorder %v689_v3, %v689_v3 }
  0xf5   : > { %v696_v6 = vand.u32 2147483647, %v690_v4  ;;  %vm692_vm1 = vcmp.ne.f32.partialorder %v690_v4, %v690_v4 }
  0xf6   : > { %v697_v7 = vsub.f32 0.0, %v695_v5 }
  0xf7   : > { %v698_v58 = vsub.f32 0.0, %v696_v6 }
  0xf8   : > { %v699_v62 = vmul.f32 1.442695, %v697_v7  ;;  %v730_v7 = vrot.slane %v1122_v15, %v1372_v32 }
  0xf9   : > { %v701_v8 = vmul.f32 1.442695, %v698_v58 }
  0xfa   : > { %1195 = vpow2.f32 %v699_v62 }
  0xfb   : > { %1197 = vpow2.f32 %v701_v8  ;;  %v761_v8 = vadd.f32 %v759_v55, %v753_v36 }
 0x107   : > { %v1196_v0 = vpop.eup %1195 }
 0x108   : > { %v1198_v59 = vpop.eup %1197  ;;  %v703_v63 = vadd.f32 1.0, %v1196_v0  ;;  %v706_v18 = vmul.f32 -0.5, %v1196_v0  ;;  %v709_v37 = vand.u32 2147483647, %v1196_v0 }
 0x109   : > { %v712_v14 = vadd.f32 1.0, %v1198_v59  ;;  %v715_v19 = vmul.f32 -0.5, %v1198_v59  ;;  %v718_v41 = vand.u32 2147483647, %v1198_v59 }
 0x10a   : > { %1199 = vlog2.f32 %v703_v63  ;;  %v707_v12 = vadd.f32 1.0, %v706_v18  ;;  %vm1534_vm14 = vcmp.lt.f32.partialorder %v709_v37, 0.0004427343 }
 0x10b   : > { %1201 = vlog2.f32 %v712_v14  ;;  %v716_v38 = vadd.f32 1.0, %v715_v19  ;;  %vm719_vm15 = vcmp.lt.f32.partialorder %v718_v41, 0.0004427343 }
 0x10c   : > { %v708_v21 = vmul.f32 %v1196_v0, %v707_v12 }
 0x10d   : > { %v717_v51 = vmul.f32 %v1198_v59, %v716_v38  ;;  %v1123_v38 = vld [vmem:[%s1327_s21 + $0x30] sm:$0x1f] }
 0x10e   : > { %v822_v41 = vrot.slane %v1123_v38, %v1352_v22  ;;  %v828_v42 = vrot.slane %v1123_v38, %v1354_v23  ;;  %v836_v45 = vrot.slane %v1123_v38, %v1356_v24 }
 0x110   : > { %v829_v13 = vmul.f32 %v828_v42, %v1362_v27  ;;  %v830_v34 = vmul.f32 %v828_v42, %v1366_v29  ;;  %v838_v57 = vmul.f32 %v836_v45, %v1370_v31 }
 0x117   : > { %v1200_v35 = vpop.eup %1199 }
 0x118   : > { %v1202_v52 = vpop.eup %1201  ;;  %v705_v54 = vmul.f32 0.6931472, %v1200_v35 }
 0x119   : > { %v714_v46 = vmul.f32 0.6931472, %v1202_v52 }
 0x11a   : > { %v711_v47 = vsel %vm1534_vm14, %v708_v21, %v705_v54  ;;  %v823_v21 = vmul.f32 %v822_v41, %v1358_v25  ;;  %v844_v54 = vrot.slane %v1123_v38, %v1364_v28  ;;  %vm983_vm14 = vcmask 31744  }
 0x11b   : > { %v720_v5 = vsel %vm719_vm15, %v717_v51, %v714_v46  ;;  %v721_v6 = vadd.f32 %v711_v47, %v687_v33  ;;  %v824_v33 = vmul.f32 %v822_v41, %v1360_v26 }
 0x11c   : > { %v722_v58 = vadd.f32 %v720_v5, %v688_v53  ;;  %v831_v55 = vadd.f32 %v829_v13, %v823_v21 }
 0x11d   : > { %v723_v62 = vsel %vm691_vm0, %v693_v56, %v721_v6  ;;  %v837_v56 = vmul.f32 %v836_v45, %v1368_v30  ;;  %v832_v36 = vadd.f32 %v830_v34, %v824_v33 }
 0x11e   : > { %v724_v60 = vsel %vm692_vm1, %v694_v49, %v722_v58  ;;  %v765_v0 = vrot.slane %v723_v62, 7  ;;  %v1546_v59 = vadd.f32 %v730_v7, %v723_v62  ;;  %v845_v62 = vmul.f32 %v844_v54, %v1378_v39 }
 0x11f   : > { %v766_v3 = vrot.slane %v724_v60, 7  ;;  %v1548_v63 = vadd.f32 %v730_v7, %v724_v60 }
 0x120   : > { %v770_v61 = vsel %vm334_vm12, -1e+30, %v765_v0 }
 0x121   : > { %v767_v2 = vsel %vm334_vm12, %v765_v0, %v766_v3  ;;  %v771_v4 = vadd.f32 %v770_v61, %v761_v8  ;;  %v846_v0 = vmul.f32 %v844_v54, %v1380_v40 }
 0x122   : > { %v772_v14 = vadd.f32 %v767_v2, %v762_v50  ;;  %v839_v50 = vadd.f32 %v837_v56, %v831_v55  ;;  %v840_v2 = vadd.f32 %v838_v57, %v832_v36 }
 0x123   : > { %v775_v15 = vsub.f32 %v771_v4, %v1546_v59  ;;  %v773_v47 = vmax.f32 %v771_v4, %v1546_v59  ;;  %v779_v8 = vadd.f32 %v771_v4, %v1546_v59 }
 0x124   : > { %v776_v16 = vsub.f32 %v772_v14, %v1548_v63  ;;  %v774_v7 = vmax.f32 %v772_v14, %v1548_v63  ;;  %v780_v3 = vadd.f32 %v772_v14, %v1548_v63  ;;  %v848_v4 = vadd.f32 %v846_v0, %v840_v2 }
 0x125   : > { %v781_v17 = vand.u32 2147483647, %v775_v15  ;;  %vm777_vm4 = vcmp.ne.f32.partialorder %v775_v15, %v775_v15 }
 0x126   : > { %v782_v18 = vand.u32 2147483647, %v776_v16  ;;  %vm778_vm5 = vcmp.ne.f32.partialorder %v776_v16, %v776_v16 }
 0x127   : > { %v783_v19 = vsub.f32 0.0, %v781_v17 }
 0x128   : > { %v784_v9 = vsub.f32 0.0, %v782_v18 }
 0x129   : > { %v785_v1 = vmul.f32 1.442695, %v783_v19  ;;  %v816_v19 = vrot.slane %v1123_v38, %v1372_v32 }
 0x12a   : > { %v787_v20 = vmul.f32 1.442695, %v784_v9 }
 0x12b   : > { %1203 = vpow2.f32 %v785_v1 }
 0x12c   : > { %1205 = vpow2.f32 %v787_v20  ;;  %v847_v20 = vadd.f32 %v845_v62, %v839_v50 }
 0x138   : > { %v1204_v12 = vpop.eup %1203 }
 0x139   : > { %v1206_v10 = vpop.eup %1205  ;;  %v789_v11 = vadd.f32 1.0, %v1204_v12  ;;  %v792_v43 = vmul.f32 -0.5, %v1204_v12  ;;  %v795_v51 = vand.u32 2147483647, %v1204_v12 }
 0x13a   : > { %v798_v37 = vadd.f32 1.0, %v1206_v10  ;;  %v801_v44 = vmul.f32 -0.5, %v1206_v10  ;;  %v804_v53 = vand.u32 2147483647, %v1206_v10 }
 0x13b   : > { %1207 = vlog2.f32 %v789_v11  ;;  %v793_v35 = vadd.f32 1.0, %v792_v43  ;;  %vm1566_vm2 = vcmp.lt.f32.partialorder %v795_v51, 0.0004427343 }
 0x13c   : > { %1209 = vlog2.f32 %v798_v37  ;;  %v802_v52 = vadd.f32 1.0, %v801_v44  ;;  %vm805_vm3 = vcmp.lt.f32.partialorder %v804_v53, 0.0004427343 }
 0x13d   : > { %v794_v46 = vmul.f32 %v1204_v12, %v793_v35 }
 0x13e   : > { %v803_v5 = vmul.f32 %v1206_v10, %v802_v52  ;;  %v1124_v52 = vld [vmem:[%s1327_s21 + $0x38] sm:$0x1f] }
 0x13f   : > { %v908_v53 = vrot.slane %v1124_v52, %v1352_v22  ;;  %v914_v54 = vrot.slane %v1124_v52, %v1354_v23  ;;  %v922_v57 = vrot.slane %v1124_v52, %v1356_v24  ;;  %v930_v22 = vrot.slane %v1124_v52, %v1364_v28 }
 0x141   : > { %v915_v36 = vmul.f32 %v914_v54, %v1362_v27  ;;  %v916_v48 = vmul.f32 %v914_v54, %v1366_v29  ;;  %v923_v23 = vmul.f32 %v922_v57, %v1368_v30  ;;  %v931_v28 = vmul.f32 %v930_v22, %v1378_v39 }
 0x148   : > { %v1208_v49 = vpop.eup %1207 }
 0x149   : > { %v1210_v6 = vpop.eup %1209  ;;  %v791_v58 = vmul.f32 0.6931472, %v1208_v49 }
 0x14a   : > { %v800_v60 = vmul.f32 0.6931472, %v1210_v6 }
 0x14b   : > { %v797_v61 = vsel %vm1566_vm2, %v794_v46, %v791_v58  ;;  %v909_v46 = vmul.f32 %v908_v53, %v1358_v25  ;;  %v924_v25 = vmul.f32 %v922_v57, %v1370_v31  ;;  %v932_v31 = vmul.f32 %v930_v22, %v1380_v40 }
 0x14c   : > { %v806_v17 = vsel %vm805_vm3, %v803_v5, %v800_v60  ;;  %v807_v18 = vadd.f32 %v797_v61, %v773_v47  ;;  %v910_v47 = vmul.f32 %v908_v53, %v1360_v26 }
 0x14d   : > { %v808_v9 = vadd.f32 %v806_v17, %v774_v7  ;;  %v917_v58 = vadd.f32 %v915_v36, %v909_v46 }
 0x14e   : > { %v809_v1 = vsel %vm777_vm4, %v779_v8, %v807_v18  ;;  %v918_v8 = vadd.f32 %v916_v48, %v910_v47 }
 0x14f   : > { %v810_v59 = vsel %vm778_vm5, %v780_v3, %v808_v9  ;;  %v851_v12 = vrot.slane %v809_v1, 7  ;;  %v1578_v10 = vadd.f32 %v816_v19, %v809_v1  ;;  %v925_v61 = vadd.f32 %v923_v23, %v917_v58 }
 0x150   : > { %v852_v15 = vrot.slane %v810_v59, 7  ;;  %v1580_v11 = vadd.f32 %v816_v19, %v810_v59  ;;  %v926_v18 = vadd.f32 %v924_v25, %v918_v8  ;;  %v902_v1 = vrot.slane %v1124_v52, %v1372_v32 }
 0x151   : > { %v856_v63 = vsel %vm334_vm12, -1e+30, %v851_v12  ;;  %v933_v59 = vadd.f32 %v931_v28, %v925_v61 }
 0x152   : > { %v853_v14 = vsel %vm334_vm12, %v851_v12, %v852_v15  ;;  %v857_v16 = vadd.f32 %v856_v63, %v847_v20  ;;  %v934_v12 = vadd.f32 %v932_v31, %v926_v18 }
 0x153   : > { %v858_v37 = vadd.f32 %v853_v14, %v848_v4 }
 0x154   : > { %v861_v38 = vsub.f32 %v857_v16, %v1578_v10  ;;  %v859_v24 = vmax.f32 %v857_v16, %v1578_v10  ;;  %v865_v30 = vadd.f32 %v857_v16, %v1578_v10 }
 0x155   : > { %v862_v41 = vsub.f32 %v858_v37, %v1580_v11  ;;  %v860_v50 = vmax.f32 %v858_v37, %v1580_v11  ;;  %v866_v2 = vadd.f32 %v858_v37, %v1580_v11 }
 0x156   : > { %v867_v42 = vand.u32 2147483647, %v861_v38  ;;  %vm863_vm8 = vcmp.ne.f32.partialorder %v861_v38, %v861_v38 }
 0x157   : > { %v868_v43 = vand.u32 2147483647, %v862_v41  ;;  %vm864_vm9 = vcmp.ne.f32.partialorder %v862_v41, %v862_v41 }
 0x158   : > { %v869_v44 = vsub.f32 0.0, %v867_v42 }
 0x159   : > { %v870_v21 = vsub.f32 0.0, %v868_v43 }
 0x15a   : > { %v871_v13 = vmul.f32 1.442695, %v869_v44 }
 0x15b   : > { %v873_v45 = vmul.f32 1.442695, %v870_v21 }
 0x15c   : > { %1211 = vpow2.f32 %v871_v13 }
 0x15d   : > { %1213 = vpow2.f32 %v873_v45 }
 0x169   : > { %v1212_v35 = vpop.eup %1211 }
 0x16a   : > { %v1214_v33 = vpop.eup %1213  ;;  %v875_v34 = vadd.f32 1.0, %v1212_v35  ;;  %v878_v55 = vmul.f32 -0.5, %v1212_v35  ;;  %v881_v5 = vand.u32 2147483647, %v1212_v35 }
 0x16b   : > { %v884_v51 = vadd.f32 1.0, %v1214_v33  ;;  %v887_v56 = vmul.f32 -0.5, %v1214_v33  ;;  %v890_v7 = vand.u32 2147483647, %v1214_v33 }
 0x16c   : > { %1215 = vlog2.f32 %v875_v34  ;;  %v879_v49 = vadd.f32 1.0, %v878_v55  ;;  %vm1598_vm6 = vcmp.lt.f32.partialorder %v881_v5, 0.0004427343 }
 0x16d   : > { %1217 = vlog2.f32 %v884_v51  ;;  %v888_v6 = vadd.f32 1.0, %v887_v56  ;;  %vm891_vm7 = vcmp.lt.f32.partialorder %v890_v7, 0.0004427343 }
 0x16e   : > { %v880_v62 = vmul.f32 %v1212_v35, %v879_v49 }
 0x16f   : > { %v889_v26 = vmul.f32 %v1214_v33, %v888_v6 }
 0x179   : > { %v1216_v27 = vpop.eup %1215 }
 0x17a   : > { %v1218_v29 = vpop.eup %1217  ;;  %v877_v0 = vmul.f32 0.6931472, %v1216_v27 }
 0x17b   : > { %v886_v3 = vmul.f32 0.6931472, %v1218_v29 }
 0x17c   : > { %v883_v17 = vsel %vm1598_vm6, %v880_v62, %v877_v0 }
 0x17d   : > { %v892_v19 = vsel %vm891_vm7, %v889_v26, %v886_v3  ;;  %v893_v9 = vadd.f32 %v883_v17, %v859_v24 }
 0x17e   : > { %v894_v20 = vadd.f32 %v892_v19, %v860_v50 }
 0x17f   : > { %v895_v39 = vsel %vm863_vm8, %v865_v30, %v893_v9 }
 0x180   : > { %v896_v4 = vsel %vm864_vm9, %v866_v2, %v894_v20  ;;  %v937_v10 = vrot.slane %v895_v39, 7  ;;  %v903_v15 = vadd.f32 %v902_v1, %v895_v39 }
 0x181   : > { %v938_v40 = vrot.slane %v896_v4, 7  ;;  %v904_v63 = vadd.f32 %v902_v1, %v896_v4 }
 0x182   : > { %v942_v11 = vsel %vm334_vm12, -1e+30, %v937_v10 }
 0x183   : > { %v939_v14 = vsel %vm334_vm12, %v937_v10, %v938_v40  ;;  %v943_v16 = vadd.f32 %v942_v11, %v933_v59 }
 0x184   : > { %v944_v37 = vadd.f32 %v939_v14, %v934_v12 }
 0x185   : > { %v947_v38 = vsub.f32 %v943_v16, %v903_v15  ;;  %v945_v57 = vmax.f32 %v943_v16, %v903_v15  ;;  %v951_v6 = vadd.f32 %v943_v16, %v903_v15 }
 0x186   : > { %v948_v41 = vsub.f32 %v944_v37, %v904_v63  ;;  %v946_v48 = vmax.f32 %v944_v37, %v904_v63  ;;  %v952_v22 = vadd.f32 %v944_v37, %v904_v63 }
 0x187   : > { %v953_v42 = vand.u32 2147483647, %v947_v38  ;;  %vm949_vm11 = vcmp.ne.f32.partialorder %v947_v38, %v947_v38 }
 0x188   : > { %v954_v43 = vand.u32 2147483647, %v948_v41  ;;  %vm950_vm13 = vcmp.ne.f32.partialorder %v948_v41, %v948_v41 }
 0x189   : > { %v955_v32 = vsub.f32 0.0, %v953_v42 }
 0x18a   : > { %v956_v44 = vsub.f32 0.0, %v954_v43 }
 0x18b   : > { %v957_v21 = vmul.f32 1.442695, %v955_v32 }
 0x18c   : > { %v959_v13 = vmul.f32 1.442695, %v956_v44 }
 0x18d   : > { %1219 = vpow2.f32 %v957_v21 }
 0x18e   : > { %1221 = vpow2.f32 %v959_v13 }
 0x19a   : > { %v1220_v45 = vpop.eup %1219 }
 0x19b   : > { %v1222_v35 = vpop.eup %1221  ;;  %v961_v33 = vadd.f32 1.0, %v1220_v45  ;;  %v964_v51 = vmul.f32 -0.5, %v1220_v45  ;;  %v967_v54 = vand.u32 2147483647, %v1220_v45 }
 0x19c   : > { %v970_v34 = vadd.f32 1.0, %v1222_v35  ;;  %v973_v52 = vmul.f32 -0.5, %v1222_v35  ;;  %v976_v56 = vand.u32 2147483647, %v1222_v35 }
 0x19d   : > { %1223 = vlog2.f32 %v961_v33  ;;  %v965_v53 = vadd.f32 1.0, %v964_v51  ;;  %vm968_vm12 = vcmp.lt.f32.partialorder %v967_v54, 0.0004427343 }
 0x19e   : > { %1225 = vlog2.f32 %v970_v34  ;;  %v974_v55 = vadd.f32 1.0, %v973_v52  ;;  %vm977_vm10 = vcmp.lt.f32.partialorder %v976_v56, 0.0004427343 }
 0x19f   : > { %v966_v46 = vmul.f32 %v1220_v45, %v965_v53 }
 0x1a0   : > { %v975_v49 = vmul.f32 %v1222_v35, %v974_v55 }
 0x1aa   : > { %v1224_v36 = vpop.eup %1223 }
 0x1ab   : > { %v1226_v47 = vpop.eup %1225  ;;  %v963_v5 = vmul.f32 0.6931472, %v1224_v36 }
 0x1ac   : > { %v972_v7 = vmul.f32 0.6931472, %v1226_v47 }
 0x1ad   : > { %v969_v58 = vsel %vm968_vm12, %v966_v46, %v963_v5 }
 0x1ae   : > { %v978_v23 = vsel %vm977_vm10, %v975_v49, %v972_v7  ;;  %v979_v62 = vadd.f32 %v969_v58, %v945_v57  ;;  %989 = sbr.rel (%p1125_p6) target bundleno = 464 (0x1d0), region = 40 }
 0x1af   : > { %v980_v8 = vadd.f32 %v978_v23, %v946_v48 }
 0x1b0   : > { %v981_v25 = vsel %vm949_vm11, %v951_v6, %v979_v62 }
 0x1b1   : > { %v982_v27 = vsel %vm950_vm13, %v952_v22, %v980_v8  ;;  %984 = vst.msk [vmem:[#allocation2] sm:$0xff] %vm983_vm14, %v981_v25 }
 0x1b2   : > { %985 = vst.msk [vmem:[#allocation2 + $0x8] sm:$0xff] %vm983_vm14, %v982_v27 }
 0x1b3   : > { %v990_v24 = vld [vmem:[#allocation4] sm:$0xff]  ;;  %v991_v60 = vld [vmem:[#allocation4 + $0x8] sm:$0xff]  ;;  %vm1007_vm15 = vcmask 24576  }
 0x1b8   : > { %v992_v26 = vld [vmem:[#allocation2] sm:$0xff] }
 0x1b9   : > { %v993_v29 = vld [vmem:[#allocation2 + $0x8] sm:$0xff]  ;;  %v994_v50 = vmul.f32 %v992_v26, %v990_v24 }
 0x1ba   : > { %v995_v0 = vmul.f32 %v993_v29, %v991_v60 }
 0x1bb   : > { %v996_v28 = vsel %vm983_vm14, %v994_v50, 0.0 }
 0x1bc   : > { %v997_v30 = vsel %vm983_vm14, %v995_v0, 0.0 }
 0x1bd   : > { %v998_v3 = vadd.f32 %v997_v30, %v996_v28 }
 0x1bf   : > { %v999_v61 = vrot.slane %v998_v3, 4 }
 0x1c1   : > { %v1000_v31 = vadd.f32 %v999_v61, %v998_v3 }
 0x1c3   : > { %v1001_v2 = vrot.slane %v1000_v31, 2 }
 0x1c5   : > { %v1002_v17 = vadd.f32 %v1001_v2, %v1000_v31 }
 0x1c7   : > { %v1003_v18 = vrot.slane %v1002_v17, 1 }
 0x1c9   : > { %v1004_v19 = vadd.f32 %v1003_v18, %v1002_v17 }
 0x1cb   : > { %v1005_v9 = vsub.f32 0.0, %v1004_v19 }
 0x1cd   : > { %v1006_v1 = vmul.f32 0.05, %v1005_v9 }
 0x1cf   : > { %1008 = vst.msk [vmem:[#allocation5] sm:$0x1] %vm1007_vm15, %v1006_v1 }
 0x1d0 PF: > { %p1615_p7 = scmp.eq.s32.totalorder %s1098_s15, 2  ;;  %s1281_s29 = smov [#allocation5]  }
 0x1d1   : > { %s1018_s30 = sshll.u32 %s1281_s29, 4  ;;  %s1019_s30 = int_to_ptr.vmem [resolvable:$true] %s1018_s30 }
 0x1d2   : > { %s1227_s4 = scalar_lea.vmem %s1019_s30, 16  ;;  %s1233_s5 = scalar_lea.vmem %s1019_s30, 32 }
 0x1d3   : > { %p1228_p8 = scmp.ne.s32.totalorder %s1019_s30, %s1227_s4  ;;  %p1234_p11 = scmp.lt.s32.totalorder %s1019_s30, %s1019_s30 }
 0x1d4   : > { %p1235_p12 = scmp.lt.s32.totalorder %s1233_s5, %s1227_s4 }
 0x1d5   : > { %p1229_p9 = pnand %p1228_p8, %p1615_p7 }
 0x1d6   : > { %p1236_p13 = por %p1235_p12, %p1234_p11 }
 0x1d7   : > { %p1230_p10 = pneg %p1229_p9 }
 0x1d9   : > { %p1237_p0 = pnand %p1236_p13, %p1230_p10 }
 0x1db   : > { %1240 = shalt.err (!%p1237_p0)
}
 0x1dc   : > { %1131 = dma.vmem_to_hbm [thread:$0]  (%p1615_p7), %s1019_s30, 16, %s1642_s3, [#allocation6]  }
 0x1dd   : > { %1264 = dma.done.wait (%p1615_p7), [#allocation6], 16  }
 0x1de   : > { %1266 = vsyncadd (%p1615_p7), [#allocation6], 4294967280 }
 0x1df PF: > { %s14_s14 = sadd.s32 1, %s1277_s14   ;;  %s1658_s12 = smov %s1273_s13 }
 0x1e0   : > { %p11_p1 = scmp.ge.s32.totalorder %s14_s14, 5   ;;  %s1659_s13 = smov %s1661_s16 }
 0x1e2   :  { %13 = sbr.rel (!%p11_p1) target bundleno = 2 (0x2), region = 87 }
 0x1e7   :  { %1031 = vsyncpa [#allocation6], 1 }
 0x1e8   :  { %1033 = vsyncpa [#allocation6 + $0x1], 1 }

</bundles_post_ra>
